<compile_context>
chip_gen: v7x
topology: tpu7x:2x2x1
jax: 0.10.0
libtpu: 0.0.40
codegen_flags: <defaults>
</compile_context>

<pallas_src>
import functools

import jax
import jax.numpy as jnp
import numpy as np
from jax.experimental import pallas as pl
from jax.experimental.pallas import tpu as pltpu

_HIGHEST = jax.lax.Precision.HIGHEST


def _bilstm_layer_kernel(pre_f_ref, pre_b_ref, whh_f_ref, whh_b_ref, out_ref,
                         h_f_sc, c_f_sc, h_b_sc, c_b_sc, out_f_sc, out_b_sc):
    """Fused fwd+bwd recurrence of one bidirectional LSTM layer (whole seq).

    pre_f_ref : (T, B, 4H)  precomputed x @ W_ih_f.T + (b_ih_f + b_hh_f)
    pre_b_ref : (T, B, 4H)  precomputed x @ W_ih_b.T + (b_ih_b + b_hh_b)
    whh_f_ref : (H, 4H)     forward  hidden->gates weight (transposed)
    whh_b_ref : (H, 4H)     backward hidden->gates weight (transposed)
    out_ref   : (T, B, 2H)  fwd hidden in [..., :H], bwd hidden in [..., H:]
    *_sc      : VMEM scratch: (B, H) states, (T, B, H) per-direction outputs
    """
    T = pre_f_ref.shape[0]
    H = whh_f_ref.shape[0]

    h_f_sc[...] = jnp.zeros_like(h_f_sc)
    c_f_sc[...] = jnp.zeros_like(c_f_sc)
    h_b_sc[...] = jnp.zeros_like(h_b_sc)
    c_b_sc[...] = jnp.zeros_like(c_b_sc)

    def cell(gates, c_prev):
        # PyTorch gate order: i, f, g, o
        i_g = jax.nn.sigmoid(gates[:, 0 * H:1 * H])
        f_g = jax.nn.sigmoid(gates[:, 1 * H:2 * H])
        g_g = jnp.tanh(gates[:, 2 * H:3 * H])
        o_g = jax.nn.sigmoid(gates[:, 3 * H:4 * H])
        c_new = f_g * c_prev + i_g * g_g
        h_new = o_g * jnp.tanh(c_new)
        return h_new, c_new

    def step(t, carry):
        tb = T - 1 - t
        # Only the recurrent h @ W_hh matmuls remain on the serial critical
        # path; both directions issued back-to-back so MXU work of one hides
        # the VPU/EUP nonlinearities of the other.
        g_f = pre_f_ref[t] + jnp.dot(h_f_sc[...], whh_f_ref[...],
                                     preferred_element_type=jnp.float32)
        g_b = pre_b_ref[tb] + jnp.dot(h_b_sc[...], whh_b_ref[...],
                                      preferred_element_type=jnp.float32)
        h_f, c_f = cell(g_f, c_f_sc[...])
        h_b, c_b = cell(g_b, c_b_sc[...])
        h_f_sc[...] = h_f
        c_f_sc[...] = c_f
        h_b_sc[...] = h_b
        c_b_sc[...] = c_b
        out_f_sc[t] = h_f
        out_b_sc[tb] = h_b
        return carry

    jax.lax.fori_loop(0, T, step, 0, unroll=True)

    # Single lane-dense store of the whole (T, B, 2H) output.
    out_ref[...] = jnp.concatenate(
        [out_f_sc[...], out_b_sc[...]], axis=-1).astype(out_ref.dtype)


def _bilstm_layer(pre_f, pre_b, whh_f_t, whh_b_t, hidden):
    """Run one fused bidirectional layer over the full sequence.

    pre_f / pre_b: (T, B, 4H) time-major precomputed input gates.
    Returns (T, B, 2H) time-major output.
    """
    T, B, _ = pre_f.shape
    vmem = pltpu.MemorySpace.VMEM
    return pl.pallas_call(
        _bilstm_layer_kernel,
        out_shape=jax.ShapeDtypeStruct((T, B, 2 * hidden), jnp.float32),
        in_specs=[pl.BlockSpec(memory_space=vmem)] * 4,
        out_specs=pl.BlockSpec(memory_space=vmem),
        scratch_shapes=[
            pltpu.VMEM((B, hidden), jnp.float32),      # h_f
            pltpu.VMEM((B, hidden), jnp.float32),      # c_f
            pltpu.VMEM((B, hidden), jnp.float32),      # h_b
            pltpu.VMEM((B, hidden), jnp.float32),      # c_b
            pltpu.VMEM((T, B, hidden), jnp.float32),   # fwd hidden, all steps
            pltpu.VMEM((T, B, hidden), jnp.float32),   # bwd hidden, all steps
        ],
    )(pre_f, pre_b, whh_f_t, whh_b_t)


def init_bilstm_params(key, input_features, hidden, num_layers):
    """Deterministic init mimicking torch.nn.LSTM: U(-1/sqrt(H), 1/sqrt(H)).

    Per layer, per direction we store (wih_t, whh_t, bias) where
    wih_t = W_ih.T  (D_l, 4H),  whh_t = W_hh.T  (H, 4H),  bias = b_ih + b_hh.
    """
    bound = 1.0 / np.sqrt(hidden)
    params = []
    for layer in range(num_layers):
        d_in = input_features if layer == 0 else 2 * hidden
        layer_p = {}
        for direction in ("fwd", "bwd"):
            key, k1, k2, k3, k4 = jax.random.split(key, 5)
            w_ih = jax.random.uniform(k1, (4 * hidden, d_in), jnp.float32,
                                      -bound, bound)
            w_hh = jax.random.uniform(k2, (4 * hidden, hidden), jnp.float32,
                                      -bound, bound)
            b_ih = jax.random.uniform(k3, (4 * hidden,), jnp.float32,
                                      -bound, bound)
            b_hh = jax.random.uniform(k4, (4 * hidden,), jnp.float32,
                                      -bound, bound)
            layer_p[direction] = (
                w_ih.T,            # (d_in, 4H)
                w_hh.T,            # (H, 4H)
                b_ih + b_hh,       # (4H,)
            )
        params.append(layer_p)
    return params


@functools.partial(jax.jit, static_argnames=("hidden",))
def bidirectional_lstm(x, params, hidden):
    """x: (B, T, D) batch-first.  Returns (B, T, 2*hidden), like torch LSTM."""
    x_tm = jnp.transpose(x, (1, 0, 2))  # time-major (T, B, D)
    for layer_p in params:
        wih_f_t, whh_f_t, bias_f = layer_p["fwd"]
        wih_b_t, whh_b_t, bias_b = layer_p["bwd"]
        # Time-batched input projections (no recurrent dependence) in XLA:
        # one (T*B, D) @ (D, 4H) matmul per direction.
        pre_f = jnp.einsum("tbd,dg->tbg", x_tm, wih_f_t,
                           precision=_HIGHEST) + bias_f
        pre_b = jnp.einsum("tbd,dg->tbg", x_tm, wih_b_t,
                           precision=_HIGHEST) + bias_b
        x_tm = _bilstm_layer(pre_f, pre_b, whh_f_t, whh_b_t, hidden)
    return jnp.transpose(x_tm, (1, 0, 2))  # back to batch-first (B, T, 2H)


# ---------------------------------------------------------------------------
# Pure-JAX reference (lax.scan) to check the Pallas kernel numerics.
# ---------------------------------------------------------------------------
def _ref_direction(x_tm, wih_t, whh_t, bias, hidden, reverse):
    T, B, _ = x_tm.shape
    xs = x_tm[::-1] if reverse else x_tm

    def step(carry, x_t):
        h, c = carry
        gates = (jnp.dot(x_t, wih_t, precision=_HIGHEST)
                 + jnp.dot(h, whh_t, precision=_HIGHEST) + bias)
        i = jax.nn.sigmoid(gates[:, 0 * hidden:1 * hidden])
        f = jax.nn.sigmoid(gates[:, 1 * hidden:2 * hidden])
        g = jnp.tanh(gates[:, 2 * hidden:3 * hidden])
        o = jax.nn.sigmoid(gates[:, 3 * hidden:4 * hidden])
        c = f * c + i * g
        h = o * jnp.tanh(c)
        return (h, c), h

    init = (jnp.zeros((B, hidden), jnp.float32),
            jnp.zeros((B, hidden), jnp.float32))
    _, hs = jax.lax.scan(step, init, xs)
    return hs[::-1] if reverse else hs


def _ref_bilstm(x, params, hidden):
    x_tm = jnp.transpose(x, (1, 0, 2))
    for layer_p in params:
        out_f = _ref_direction(x_tm, *layer_p["fwd"], hidden, reverse=False)
        out_b = _ref_direction(x_tm, *layer_p["bwd"], hidden, reverse=True)
        x_tm = jnp.concatenate([out_f, out_b], axis=-1)
    return jnp.transpose(x_tm, (1, 0, 2))


if __name__ == "__main__":
    # paramsDecoder = {'inputFeatures': 16, 'hiddenDimensions': 32, 'lstmLayers': 2}
    batch, seq, input_features, hidden, num_layers = 2, 8, 16, 32, 2

    key = jax.random.PRNGKey(0)
    key, xk, pk = jax.random.split(key, 3)
    x = jax.random.normal(xk, (batch, seq, input_features), jnp.float32)
    params = init_bilstm_params(pk, input_features, hidden, num_layers)

    out = bidirectional_lstm(x, params, hidden)
    out = jax.block_until_ready(out)
    assert out.shape == (batch, seq, 2 * hidden), out.shape

    ref = jax.block_until_ready(_ref_bilstm(x, params, hidden))
    np.testing.assert_allclose(np.asarray(out), np.asarray(ref),
                               rtol=1e-5, atol=1e-5)

    print("KERNEL_OK")
</pallas_src>

<mosaic_0001>
module attributes {stable_mosaic.version = 11 : i64} {
  func.func @_bilstm_layer_kernel(%arg0: memref<8x2x128xf32, #tpu.memory_space<vmem>>, %arg1: memref<8x2x128xf32, #tpu.memory_space<vmem>>, %arg2: memref<32x128xf32, #tpu.memory_space<vmem>>, %arg3: memref<32x128xf32, #tpu.memory_space<vmem>>, %arg4: memref<8x2x64xf32, #tpu.memory_space<vmem>>, %arg5: memref<2x32xf32, #tpu.memory_space<vmem>>, %arg6: memref<2x32xf32, #tpu.memory_space<vmem>>, %arg7: memref<2x32xf32, #tpu.memory_space<vmem>>, %arg8: memref<2x32xf32, #tpu.memory_space<vmem>>, %arg9: memref<8x2x32xf32, #tpu.memory_space<vmem>>, %arg10: memref<8x2x32xf32, #tpu.memory_space<vmem>>) attributes {dimension_semantics = [], scalar_prefetch = 0 : i64, scratch_operands = 6 : i64, tpu.core_type = #tpu.core_type<tc>} {
    %cst = arith.constant 0.000000e+00 : f32
    %0 = vector.broadcast %cst : f32 to vector<2x32xf32>
    %c0 = arith.constant 0 : index
    %c0_0 = arith.constant 0 : index
    %1 = vector.load %arg5[%c0, %c0_0] : memref<2x32xf32, #tpu.memory_space<vmem>>, vector<2x32xf32>
    tpu.vector_store %arg5[%c0, %c0_0], %0 {strides = array<i32>} : memref<2x32xf32, #tpu.memory_space<vmem>>, vector<2x32xf32>,
    %cst_1 = arith.constant 0.000000e+00 : f32
    %2 = vector.broadcast %cst_1 : f32 to vector<2x32xf32>
    %c0_2 = arith.constant 0 : index
    %c0_3 = arith.constant 0 : index
    %3 = vector.load %arg6[%c0_2, %c0_3] : memref<2x32xf32, #tpu.memory_space<vmem>>, vector<2x32xf32>
    tpu.vector_store %arg6[%c0_2, %c0_3], %2 {strides = array<i32>} : memref<2x32xf32, #tpu.memory_space<vmem>>, vector<2x32xf32>,
    %cst_4 = arith.constant 0.000000e+00 : f32
    %4 = vector.broadcast %cst_4 : f32 to vector<2x32xf32>
    %c0_5 = arith.constant 0 : index
    %c0_6 = arith.constant 0 : index
    %5 = vector.load %arg7[%c0_5, %c0_6] : memref<2x32xf32, #tpu.memory_space<vmem>>, vector<2x32xf32>
    tpu.vector_store %arg7[%c0_5, %c0_6], %4 {strides = array<i32>} : memref<2x32xf32, #tpu.memory_space<vmem>>, vector<2x32xf32>,
    %cst_7 = arith.constant 0.000000e+00 : f32
    %6 = vector.broadcast %cst_7 : f32 to vector<2x32xf32>
    %c0_8 = arith.constant 0 : index
    %c0_9 = arith.constant 0 : index
    %7 = vector.load %arg8[%c0_8, %c0_9] : memref<2x32xf32, #tpu.memory_space<vmem>>, vector<2x32xf32>
    tpu.vector_store %arg8[%c0_8, %c0_9], %6 {strides = array<i32>} : memref<2x32xf32, #tpu.memory_space<vmem>>, vector<2x32xf32>,
    %c0_i32 = arith.constant 0 : i32
    %c7_i32 = arith.constant 7 : i32
    %8 = arith.subi %c7_i32, %c0_i32 : i32
    %9 = arith.index_cast %c0_i32 : i32 to index
    %c0_10 = arith.constant 0 : index
    %c0_11 = arith.constant 0 : index
    %10 = vector.load %arg0[%9, %c0_10, %c0_11] : memref<8x2x128xf32, #tpu.memory_space<vmem>>, vector<1x2x128xf32>
    %11 = vector.shape_cast %10 : vector<1x2x128xf32> to vector<2x128xf32>
    %c0_12 = arith.constant 0 : index
    %c0_13 = arith.constant 0 : index
    %12 = vector.load %arg5[%c0_12, %c0_13] : memref<2x32xf32, #tpu.memory_space<vmem>>, vector<2x32xf32>
    %c0_14 = arith.constant 0 : index
    %c0_15 = arith.constant 0 : index
    %13 = vector.load %arg2[%c0_14, %c0_15] : memref<32x128xf32, #tpu.memory_space<vmem>>, vector<32x128xf32>
    %cst_16 = arith.constant dense<0.000000e+00> : vector<2x128xf32>
    %14 = tpu.matmul %12, %13, %cst_16 {dimension_numbers = #tpu.dot_dimension_numbers<[1], [0], [0], [1], [0, 0, 1, 1], [], []>} : vector<2x32xf32>, vector<32x128xf32>, vector<2x128xf32> -> vector<2x128xf32>
    %15 = arith.addf %11, %14 : vector<2x128xf32>
    %16 = arith.index_cast %8 : i32 to index
    %c0_17 = arith.constant 0 : index
    %c0_18 = arith.constant 0 : index
    %17 = vector.load %arg1[%16, %c0_17, %c0_18] : memref<8x2x128xf32, #tpu.memory_space<vmem>>, vector<1x2x128xf32>
    %18 = vector.shape_cast %17 : vector<1x2x128xf32> to vector<2x128xf32>
    %c0_19 = arith.constant 0 : index
    %c0_20 = arith.constant 0 : index
    %19 = vector.load %arg7[%c0_19, %c0_20] : memref<2x32xf32, #tpu.memory_space<vmem>>, vector<2x32xf32>
    %c0_21 = arith.constant 0 : index
    %c0_22 = arith.constant 0 : index
    %20 = vector.load %arg3[%c0_21, %c0_22] : memref<32x128xf32, #tpu.memory_space<vmem>>, vector<32x128xf32>
    %cst_23 = arith.constant dense<0.000000e+00> : vector<2x128xf32>
    %21 = tpu.matmul %19, %20, %cst_23 {dimension_numbers = #tpu.dot_dimension_numbers<[1], [0], [0], [1], [0, 0, 1, 1], [], []>} : vector<2x32xf32>, vector<32x128xf32>, vector<2x128xf32> -> vector<2x128xf32>
    %22 = arith.addf %18, %21 : vector<2x128xf32>
    %c0_24 = arith.constant 0 : index
    %c0_25 = arith.constant 0 : index
    %23 = vector.load %arg6[%c0_24, %c0_25] : memref<2x32xf32, #tpu.memory_space<vmem>>, vector<2x32xf32>
    %24 = vector.extract_strided_slice %15 {offsets = [0, 0], sizes = [2, 32], strides = [1, 1]} : vector<2x128xf32> to vector<2x32xf32>
    %25 = arith.negf %24 : vector<2x32xf32>
    %26 = math.exp %25 : vector<2x32xf32>
    %cst_26 = arith.constant 1.000000e+00 : f32
    %27 = vector.broadcast %cst_26 : f32 to vector<2x32xf32>
    %28 = arith.addf %27, %26 : vector<2x32xf32>
    %29 = arith.divf %27, %28 : vector<2x32xf32>
    %30 = vector.extract_strided_slice %15 {offsets = [0, 32], sizes = [2, 32], strides = [1, 1]} : vector<2x128xf32> to vector<2x32xf32>
    %31 = arith.negf %30 : vector<2x32xf32>
    %32 = math.exp %31 : vector<2x32xf32>
    %cst_27 = arith.constant 1.000000e+00 : f32
    %33 = vector.broadcast %cst_27 : f32 to vector<2x32xf32>
    %34 = arith.addf %33, %32 : vector<2x32xf32>
    %35 = arith.divf %33, %34 : vector<2x32xf32>
    %36 = vector.extract_strided_slice %15 {offsets = [0, 64], sizes = [2, 32], strides = [1, 1]} : vector<2x128xf32> to vector<2x32xf32>
    %37 = math.tanh %36 : vector<2x32xf32>
    %38 = vector.extract_strided_slice %15 {offsets = [0, 96], sizes = [2, 32], strides = [1, 1]} : vector<2x128xf32> to vector<2x32xf32>
    %39 = arith.negf %38 : vector<2x32xf32>
    %40 = math.exp %39 : vector<2x32xf32>
    %cst_28 = arith.constant 1.000000e+00 : f32
    %41 = vector.broadcast %cst_28 : f32 to vector<2x32xf32>
    %42 = arith.addf %41, %40 : vector<2x32xf32>
    %43 = arith.divf %41, %42 : vector<2x32xf32>
    %44 = arith.mulf %35, %23 : vector<2x32xf32>
    %45 = arith.mulf %29, %37 : vector<2x32xf32>
    %46 = arith.addf %44, %45 : vector<2x32xf32>
    %47 = math.tanh %46 : vector<2x32xf32>
    %48 = arith.mulf %43, %47 : vector<2x32xf32>
    %c0_29 = arith.constant 0 : index
    %c0_30 = arith.constant 0 : index
    %49 = vector.load %arg8[%c0_29, %c0_30] : memref<2x32xf32, #tpu.memory_space<vmem>>, vector<2x32xf32>
    %50 = vector.extract_strided_slice %22 {offsets = [0, 0], sizes = [2, 32], strides = [1, 1]} : vector<2x128xf32> to vector<2x32xf32>
    %51 = arith.negf %50 : vector<2x32xf32>
    %52 = math.exp %51 : vector<2x32xf32>
    %cst_31 = arith.constant 1.000000e+00 : f32
    %53 = vector.broadcast %cst_31 : f32 to vector<2x32xf32>
    %54 = arith.addf %53, %52 : vector<2x32xf32>
    %55 = arith.divf %53, %54 : vector<2x32xf32>
    %56 = vector.extract_strided_slice %22 {offsets = [0, 32], sizes = [2, 32], strides = [1, 1]} : vector<2x128xf32> to vector<2x32xf32>
    %57 = arith.negf %56 : vector<2x32xf32>
    %58 = math.exp %57 : vector<2x32xf32>
    %cst_32 = arith.constant 1.000000e+00 : f32
    %59 = vector.broadcast %cst_32 : f32 to vector<2x32xf32>
    %60 = arith.addf %59, %58 : vector<2x32xf32>
    %61 = arith.divf %59, %60 : vector<2x32xf32>
    %62 = vector.extract_strided_slice %22 {offsets = [0, 64], sizes = [2, 32], strides = [1, 1]} : vector<2x128xf32> to vector<2x32xf32>
    %63 = math.tanh %62 : vector<2x32xf32>
    %64 = vector.extract_strided_slice %22 {offsets = [0, 96], sizes = [2, 32], strides = [1, 1]} : vector<2x128xf32> to vector<2x32xf32>
    %65 = arith.negf %64 : vector<2x32xf32>
    %66 = math.exp %65 : vector<2x32xf32>
    %cst_33 = arith.constant 1.000000e+00 : f32
    %67 = vector.broadcast %cst_33 : f32 to vector<2x32xf32>
    %68 = arith.addf %67, %66 : vector<2x32xf32>
    %69 = arith.divf %67, %68 : vector<2x32xf32>
    %70 = arith.mulf %61, %49 : vector<2x32xf32>
    %71 = arith.mulf %55, %63 : vector<2x32xf32>
    %72 = arith.addf %70, %71 : vector<2x32xf32>
    %73 = math.tanh %72 : vector<2x32xf32>
    %74 = arith.mulf %69, %73 : vector<2x32xf32>
    %c0_34 = arith.constant 0 : index
    %c0_35 = arith.constant 0 : index
    %75 = vector.load %arg5[%c0_34, %c0_35] : memref<2x32xf32, #tpu.memory_space<vmem>>, vector<2x32xf32>
    tpu.vector_store %arg5[%c0_34, %c0_35], %48 {strides = array<i32>} : memref<2x32xf32, #tpu.memory_space<vmem>>, vector<2x32xf32>,
    %c0_36 = arith.constant 0 : index
    %c0_37 = arith.constant 0 : index
    %76 = vector.load %arg6[%c0_36, %c0_37] : memref<2x32xf32, #tpu.memory_space<vmem>>, vector<2x32xf32>
    tpu.vector_store %arg6[%c0_36, %c0_37], %46 {strides = array<i32>} : memref<2x32xf32, #tpu.memory_space<vmem>>, vector<2x32xf32>,
    %c0_38 = arith.constant 0 : index
    %c0_39 = arith.constant 0 : index
    %77 = vector.load %arg7[%c0_38, %c0_39] : memref<2x32xf32, #tpu.memory_space<vmem>>, vector<2x32xf32>
    tpu.vector_store %arg7[%c0_38, %c0_39], %74 {strides = array<i32>} : memref<2x32xf32, #tpu.memory_space<vmem>>, vector<2x32xf32>,
    %c0_40 = arith.constant 0 : index
    %c0_41 = arith.constant 0 : index
    %78 = vector.load %arg8[%c0_40, %c0_41] : memref<2x32xf32, #tpu.memory_space<vmem>>, vector<2x32xf32>
    tpu.vector_store %arg8[%c0_40, %c0_41], %72 {strides = array<i32>} : memref<2x32xf32, #tpu.memory_space<vmem>>, vector<2x32xf32>,
    %79 = arith.index_cast %c0_i32 : i32 to index
    %c0_42 = arith.constant 0 : index
    %c0_43 = arith.constant 0 : index
    %80 = vector.load %arg9[%79, %c0_42, %c0_43] : memref<8x2x32xf32, #tpu.memory_space<vmem>>, vector<1x2x32xf32>
    %81 = vector.shape_cast %80 : vector<1x2x32xf32> to vector<2x32xf32>
    %82 = vector.shape_cast %48 : vector<2x32xf32> to vector<1x2x32xf32>
    tpu.vector_store %arg9[%79, %c0_42, %c0_43], %82 {strides = array<i32>} : memref<8x2x32xf32, #tpu.memory_space<vmem>>, vector<1x2x32xf32>,
    %83 = arith.index_cast %8 : i32 to index
    %c0_44 = arith.constant 0 : index
    %c0_45 = arith.constant 0 : index
    %84 = vector.load %arg10[%83, %c0_44, %c0_45] : memref<8x2x32xf32, #tpu.memory_space<vmem>>, vector<1x2x32xf32>
    %85 = vector.shape_cast %84 : vector<1x2x32xf32> to vector<2x32xf32>
    %86 = vector.shape_cast %74 : vector<2x32xf32> to vector<1x2x32xf32>
    tpu.vector_store %arg10[%83, %c0_44, %c0_45], %86 {strides = array<i32>} : memref<8x2x32xf32, #tpu.memory_space<vmem>>, vector<1x2x32xf32>,
    %c1_i32 = arith.constant 1 : i32
    %c7_i32_46 = arith.constant 7 : i32
    %87 = arith.subi %c7_i32_46, %c1_i32 : i32
    %88 = arith.index_cast %c1_i32 : i32 to index
    %c0_47 = arith.constant 0 : index
    %c0_48 = arith.constant 0 : index
    %89 = vector.load %arg0[%88, %c0_47, %c0_48] : memref<8x2x128xf32, #tpu.memory_space<vmem>>, vector<1x2x128xf32>
    %90 = vector.shape_cast %89 : vector<1x2x128xf32> to vector<2x128xf32>
    %c0_49 = arith.constant 0 : index
    %c0_50 = arith.constant 0 : index
    %91 = vector.load %arg5[%c0_49, %c0_50] : memref<2x32xf32, #tpu.memory_space<vmem>>, vector<2x32xf32>
    %c0_51 = arith.constant 0 : index
    %c0_52 = arith.constant 0 : index
    %92 = vector.load %arg2[%c0_51, %c0_52] : memref<32x128xf32, #tpu.memory_space<vmem>>, vector<32x128xf32>
    %cst_53 = arith.constant dense<0.000000e+00> : vector<2x128xf32>
    %93 = tpu.matmul %91, %92, %cst_53 {dimension_numbers = #tpu.dot_dimension_numbers<[1], [0], [0], [1], [0, 0, 1, 1], [], []>} : vector<2x32xf32>, vector<32x128xf32>, vector<2x128xf32> -> vector<2x128xf32>
    %94 = arith.addf %90, %93 : vector<2x128xf32>
    %95 = arith.index_cast %87 : i32 to index
    %c0_54 = arith.constant 0 : index
    %c0_55 = arith.constant 0 : index
    %96 = vector.load %arg1[%95, %c0_54, %c0_55] : memref<8x2x128xf32, #tpu.memory_space<vmem>>, vector<1x2x128xf32>
    %97 = vector.shape_cast %96 : vector<1x2x128xf32> to vector<2x128xf32>
    %c0_56 = arith.constant 0 : index
    %c0_57 = arith.constant 0 : index
    %98 = vector.load %arg7[%c0_56, %c0_57] : memref<2x32xf32, #tpu.memory_space<vmem>>, vector<2x32xf32>
    %c0_58 = arith.constant 0 : index
    %c0_59 = arith.constant 0 : index
    %99 = vector.load %arg3[%c0_58, %c0_59] : memref<32x128xf32, #tpu.memory_space<vmem>>, vector<32x128xf32>
    %cst_60 = arith.constant dense<0.000000e+00> : vector<2x128xf32>
    %100 = tpu.matmul %98, %99, %cst_60 {dimension_numbers = #tpu.dot_dimension_numbers<[1], [0], [0], [1], [0, 0, 1, 1], [], []>} : vector<2x32xf32>, vector<32x128xf32>, vector<2x128xf32> -> vector<2x128xf32>
    %101 = arith.addf %97, %100 : vector<2x128xf32>
    %c0_61 = arith.constant 0 : index
    %c0_62 = arith.constant 0 : index
    %102 = vector.load %arg6[%c0_61, %c0_62] : memref<2x32xf32, #tpu.memory_space<vmem>>, vector<2x32xf32>
    %103 = vector.extract_strided_slice %94 {offsets = [0, 0], sizes = [2, 32], strides = [1, 1]} : vector<2x128xf32> to vector<2x32xf32>
    %104 = arith.negf %103 : vector<2x32xf32>
    %105 = math.exp %104 : vector<2x32xf32>
    %cst_63 = arith.constant 1.000000e+00 : f32
    %106 = vector.broadcast %cst_63 : f32 to vector<2x32xf32>
    %107 = arith.addf %106, %105 : vector<2x32xf32>
    %108 = arith.divf %106, %107 : vector<2x32xf32>
    %109 = vector.extract_strided_slice %94 {offsets = [0, 32], sizes = [2, 32], strides = [1, 1]} : vector<2x128xf32> to vector<2x32xf32>
    %110 = arith.negf %109 : vector<2x32xf32>
    %111 = math.exp %110 : vector<2x32xf32>
    %cst_64 = arith.constant 1.000000e+00 : f32
    %112 = vector.broadcast %cst_64 : f32 to vector<2x32xf32>
    %113 = arith.addf %112, %111 : vector<2x32xf32>
    %114 = arith.divf %112, %113 : vector<2x32xf32>
    %115 = vector.extract_strided_slice %94 {offsets = [0, 64], sizes = [2, 32], strides = [1, 1]} : vector<2x128xf32> to vector<2x32xf32>
    %116 = math.tanh %115 : vector<2x32xf32>
    %117 = vector.extract_strided_slice %94 {offsets = [0, 96], sizes = [2, 32], strides = [1, 1]} : vector<2x128xf32> to vector<2x32xf32>
    %118 = arith.negf %117 : vector<2x32xf32>
    %119 = math.exp %118 : vector<2x32xf32>
    %cst_65 = arith.constant 1.000000e+00 : f32
    %120 = vector.broadcast %cst_65 : f32 to vector<2x32xf32>
    %121 = arith.addf %120, %119 : vector<2x32xf32>
    %122 = arith.divf %120, %121 : vector<2x32xf32>
    %123 = arith.mulf %114, %102 : vector<2x32xf32>
    %124 = arith.mulf %108, %116 : vector<2x32xf32>
    %125 = arith.addf %123, %124 : vector<2x32xf32>
    %126 = math.tanh %125 : vector<2x32xf32>
    %127 = arith.mulf %122, %126 : vector<2x32xf32>
    %c0_66 = arith.constant 0 : index
    %c0_67 = arith.constant 0 : index
    %128 = vector.load %arg8[%c0_66, %c0_67] : memref<2x32xf32, #tpu.memory_space<vmem>>, vector<2x32xf32>
    %129 = vector.extract_strided_slice %101 {offsets = [0, 0], sizes = [2, 32], strides = [1, 1]} : vector<2x128xf32> to vector<2x32xf32>
    %130 = arith.negf %129 : vector<2x32xf32>
    %131 = math.exp %130 : vector<2x32xf32>
    %cst_68 = arith.constant 1.000000e+00 : f32
    %132 = vector.broadcast %cst_68 : f32 to vector<2x32xf32>
    %133 = arith.addf %132, %131 : vector<2x32xf32>
    %134 = arith.divf %132, %133 : vector<2x32xf32>
    %135 = vector.extract_strided_slice %101 {offsets = [0, 32], sizes = [2, 32], strides = [1, 1]} : vector<2x128xf32> to vector<2x32xf32>
    %136 = arith.negf %135 : vector<2x32xf32>
    %137 = math.exp %136 : vector<2x32xf32>
    %cst_69 = arith.constant 1.000000e+00 : f32
    %138 = vector.broadcast %cst_69 : f32 to vector<2x32xf32>
    %139 = arith.addf %138, %137 : vector<2x32xf32>
    %140 = arith.divf %138, %139 : vector<2x32xf32>
    %141 = vector.extract_strided_slice %101 {offsets = [0, 64], sizes = [2, 32], strides = [1, 1]} : vector<2x128xf32> to vector<2x32xf32>
    %142 = math.tanh %141 : vector<2x32xf32>
    %143 = vector.extract_strided_slice %101 {offsets = [0, 96], sizes = [2, 32], strides = [1, 1]} : vector<2x128xf32> to vector<2x32xf32>
    %144 = arith.negf %143 : vector<2x32xf32>
    %145 = math.exp %144 : vector<2x32xf32>
    %cst_70 = arith.constant 1.000000e+00 : f32
    %146 = vector.broadcast %cst_70 : f32 to vector<2x32xf32>
    %147 = arith.addf %146, %145 : vector<2x32xf32>
    %148 = arith.divf %146, %147 : vector<2x32xf32>
    %149 = arith.mulf %140, %128 : vector<2x32xf32>
    %150 = arith.mulf %134, %142 : vector<2x32xf32>
    %151 = arith.addf %149, %150 : vector<2x32xf32>
    %152 = math.tanh %151 : vector<2x32xf32>
    %153 = arith.mulf %148, %152 : vector<2x32xf32>
    %c0_71 = arith.constant 0 : index
    %c0_72 = arith.constant 0 : index
    %154 = vector.load %arg5[%c0_71, %c0_72] : memref<2x32xf32, #tpu.memory_space<vmem>>, vector<2x32xf32>
    tpu.vector_store %arg5[%c0_71, %c0_72], %127 {strides = array<i32>} : memref<2x32xf32, #tpu.memory_space<vmem>>, vector<2x32xf32>,
    %c0_73 = arith.constant 0 : index
    %c0_74 = arith.constant 0 : index
    %155 = vector.load %arg6[%c0_73, %c0_74] : memref<2x32xf32, #tpu.memory_space<vmem>>, vector<2x32xf32>
    tpu.vector_store %arg6[%c0_73, %c0_74], %125 {strides = array<i32>} : memref<2x32xf32, #tpu.memory_space<vmem>>, vector<2x32xf32>,
    %c0_75 = arith.constant 0 : index
    %c0_76 = arith.constant 0 : index
    %156 = vector.load %arg7[%c0_75, %c0_76] : memref<2x32xf32, #tpu.memory_space<vmem>>, vector<2x32xf32>
    tpu.vector_store %arg7[%c0_75, %c0_76], %153 {strides = array<i32>} : memref<2x32xf32, #tpu.memory_space<vmem>>, vector<2x32xf32>,
    %c0_77 = arith.constant 0 : index
    %c0_78 = arith.constant 0 : index
    %157 = vector.load %arg8[%c0_77, %c0_78] : memref<2x32xf32, #tpu.memory_space<vmem>>, vector<2x32xf32>
    tpu.vector_store %arg8[%c0_77, %c0_78], %151 {strides = array<i32>} : memref<2x32xf32, #tpu.memory_space<vmem>>, vector<2x32xf32>,
    %158 = arith.index_cast %c1_i32 : i32 to index
    %c0_79 = arith.constant 0 : index
    %c0_80 = arith.constant 0 : index
    %159 = vector.load %arg9[%158, %c0_79, %c0_80] : memref<8x2x32xf32, #tpu.memory_space<vmem>>, vector<1x2x32xf32>
    %160 = vector.shape_cast %159 : vector<1x2x32xf32> to vector<2x32xf32>
    %161 = vector.shape_cast %127 : vector<2x32xf32> to vector<1x2x32xf32>
    tpu.vector_store %arg9[%158, %c0_79, %c0_80], %161 {strides = array<i32>} : memref<8x2x32xf32, #tpu.memory_space<vmem>>, vector<1x2x32xf32>,
    %162 = arith.index_cast %87 : i32 to index
    %c0_81 = arith.constant 0 : index
    %c0_82 = arith.constant 0 : index
    %163 = vector.load %arg10[%162, %c0_81, %c0_82] : memref<8x2x32xf32, #tpu.memory_space<vmem>>, vector<1x2x32xf32>
    %164 = vector.shape_cast %163 : vector<1x2x32xf32> to vector<2x32xf32>
    %165 = vector.shape_cast %153 : vector<2x32xf32> to vector<1x2x32xf32>
    tpu.vector_store %arg10[%162, %c0_81, %c0_82], %165 {strides = array<i32>} : memref<8x2x32xf32, #tpu.memory_space<vmem>>, vector<1x2x32xf32>,
    %c2_i32 = arith.constant 2 : i32
    %c7_i32_83 = arith.constant 7 : i32
    %166 = arith.subi %c7_i32_83, %c2_i32 : i32
    %167 = arith.index_cast %c2_i32 : i32 to index
    %c0_84 = arith.constant 0 : index
    %c0_85 = arith.constant 0 : index
    %168 = vector.load %arg0[%167, %c0_84, %c0_85] : memref<8x2x128xf32, #tpu.memory_space<vmem>>, vector<1x2x128xf32>
    %169 = vector.shape_cast %168 : vector<1x2x128xf32> to vector<2x128xf32>
    %c0_86 = arith.constant 0 : index
    %c0_87 = arith.constant 0 : index
    %170 = vector.load %arg5[%c0_86, %c0_87] : memref<2x32xf32, #tpu.memory_space<vmem>>, vector<2x32xf32>
    %c0_88 = arith.constant 0 : index
    %c0_89 = arith.constant 0 : index
    %171 = vector.load %arg2[%c0_88, %c0_89] : memref<32x128xf32, #tpu.memory_space<vmem>>, vector<32x128xf32>
    %cst_90 = arith.constant dense<0.000000e+00> : vector<2x128xf32>
    %172 = tpu.matmul %170, %171, %cst_90 {dimension_numbers = #tpu.dot_dimension_numbers<[1], [0], [0], [1], [0, 0, 1, 1], [], []>} : vector<2x32xf32>, vector<32x128xf32>, vector<2x128xf32> -> vector<2x128xf32>
    %173 = arith.addf %169, %172 : vector<2x128xf32>
    %174 = arith.index_cast %166 : i32 to index
    %c0_91 = arith.constant 0 : index
    %c0_92 = arith.constant 0 : index
    %175 = vector.load %arg1[%174, %c0_91, %c0_92] : memref<8x2x128xf32, #tpu.memory_space<vmem>>, vector<1x2x128xf32>
    %176 = vector.shape_cast %175 : vector<1x2x128xf32> to vector<2x128xf32>
    %c0_93 = arith.constant 0 : index
    %c0_94 = arith.constant 0 : index
    %177 = vector.load %arg7[%c0_93, %c0_94] : memref<2x32xf32, #tpu.memory_space<vmem>>, vector<2x32xf32>
    %c0_95 = arith.constant 0 : index
    %c0_96 = arith.constant 0 : index
    %178 = vector.load %arg3[%c0_95, %c0_96] : memref<32x128xf32, #tpu.memory_space<vmem>>, vector<32x128xf32>
    %cst_97 = arith.constant dense<0.000000e+00> : vector<2x128xf32>
    %179 = tpu.matmul %177, %178, %cst_97 {dimension_numbers = #tpu.dot_dimension_numbers<[1], [0], [0], [1], [0, 0, 1, 1], [], []>} : vector<2x32xf32>, vector<32x128xf32>, vector<2x128xf32> -> vector<2x128xf32>
    %180 = arith.addf %176, %179 : vector<2x128xf32>
    %c0_98 = arith.constant 0 : index
    %c0_99 = arith.constant 0 : index
    %181 = vector.load %arg6[%c0_98, %c0_99] : memref<2x32xf32, #tpu.memory_space<vmem>>, vector<2x32xf32>
    %182 = vector.extract_strided_slice %173 {offsets = [0, 0], sizes = [2, 32], strides = [1, 1]} : vector<2x128xf32> to vector<2x32xf32>
    %183 = arith.negf %182 : vector<2x32xf32>
    %184 = math.exp %183 : vector<2x32xf32>
    %cst_100 = arith.constant 1.000000e+00 : f32
    %185 = vector.broadcast %cst_100 : f32 to vector<2x32xf32>
    %186 = arith.addf %185, %184 : vector<2x32xf32>
    %187 = arith.divf %185, %186 : vector<2x32xf32>
    %188 = vector.extract_strided_slice %173 {offsets = [0, 32], sizes = [2, 32], strides = [1, 1]} : vector<2x128xf32> to vector<2x32xf32>
    %189 = arith.negf %188 : vector<2x32xf32>
    %190 = math.exp %189 : vector<2x32xf32>
    %cst_101 = arith.constant 1.000000e+00 : f32
    %191 = vector.broadcast %cst_101 : f32 to vector<2x32xf32>
    %192 = arith.addf %191, %190 : vector<2x32xf32>
    %193 = arith.divf %191, %192 : vector<2x32xf32>
    %194 = vector.extract_strided_slice %173 {offsets = [0, 64], sizes = [2, 32], strides = [1, 1]} : vector<2x128xf32> to vector<2x32xf32>
    %195 = math.tanh %194 : vector<2x32xf32>
    %196 = vector.extract_strided_slice %173 {offsets = [0, 96], sizes = [2, 32], strides = [1, 1]} : vector<2x128xf32> to vector<2x32xf32>
    %197 = arith.negf %196 : vector<2x32xf32>
    %198 = math.exp %197 : vector<2x32xf32>
    %cst_102 = arith.constant 1.000000e+00 : f32
    %199 = vector.broadcast %cst_102 : f32 to vector<2x32xf32>
    %200 = arith.addf %199, %198 : vector<2x32xf32>
    %201 = arith.divf %199, %200 : vector<2x32xf32>
    %202 = arith.mulf %193, %181 : vector<2x32xf32>
    %203 = arith.mulf %187, %195 : vector<2x32xf32>
    %204 = arith.addf %202, %203 : vector<2x32xf32>
    %205 = math.tanh %204 : vector<2x32xf32>
    %206 = arith.mulf %201, %205 : vector<2x32xf32>
    %c0_103 = arith.constant 0 : index
    %c0_104 = arith.constant 0 : index
    %207 = vector.load %arg8[%c0_103, %c0_104] : memref<2x32xf32, #tpu.memory_space<vmem>>, vector<2x32xf32>
    %208 = vector.extract_strided_slice %180 {offsets = [0, 0], sizes = [2, 32], strides = [1, 1]} : vector<2x128xf32> to vector<2x32xf32>
    %209 = arith.negf %208 : vector<2x32xf32>
    %210 = math.exp %209 : vector<2x32xf32>
    %cst_105 = arith.constant 1.000000e+00 : f32
    %211 = vector.broadcast %cst_105 : f32 to vector<2x32xf32>
    %212 = arith.addf %211, %210 : vector<2x32xf32>
    %213 = arith.divf %211, %212 : vector<2x32xf32>
    %214 = vector.extract_strided_slice %180 {offsets = [0, 32], sizes = [2, 32], strides = [1, 1]} : vector<2x128xf32> to vector<2x32xf32>
    %215 = arith.negf %214 : vector<2x32xf32>
    %216 = math.exp %215 : vector<2x32xf32>
    %cst_106 = arith.constant 1.000000e+00 : f32
    %217 = vector.broadcast %cst_106 : f32 to vector<2x32xf32>
    %218 = arith.addf %217, %216 : vector<2x32xf32>
    %219 = arith.divf %217, %218 : vector<2x32xf32>
    %220 = vector.extract_strided_slice %180 {offsets = [0, 64], sizes = [2, 32], strides = [1, 1]} : vector<2x128xf32> to vector<2x32xf32>
    %221 = math.tanh %220 : vector<2x32xf32>
    %222 = vector.extract_strided_slice %180 {offsets = [0, 96], sizes = [2, 32], strides = [1, 1]} : vector<2x128xf32> to vector<2x32xf32>
    %223 = arith.negf %222 : vector<2x32xf32>
    %224 = math.exp %223 : vector<2x32xf32>
    %cst_107 = arith.constant 1.000000e+00 : f32
    %225 = vector.broadcast %cst_107 : f32 to vector<2x32xf32>
    %226 = arith.addf %225, %224 : vector<2x32xf32>
    %227 = arith.divf %225, %226 : vector<2x32xf32>
    %228 = arith.mulf %219, %207 : vector<2x32xf32>
    %229 = arith.mulf %213, %221 : vector<2x32xf32>
    %230 = arith.addf %228, %229 : vector<2x32xf32>
    %231 = math.tanh %230 : vector<2x32xf32>
    %232 = arith.mulf %227, %231 : vector<2x32xf32>
    %c0_108 = arith.constant 0 : index
    %c0_109 = arith.constant 0 : index
    %233 = vector.load %arg5[%c0_108, %c0_109] : memref<2x32xf32, #tpu.memory_space<vmem>>, vector<2x32xf32>
    tpu.vector_store %arg5[%c0_108, %c0_109], %206 {strides = array<i32>} : memref<2x32xf32, #tpu.memory_space<vmem>>, vector<2x32xf32>,
    %c0_110 = arith.constant 0 : index
    %c0_111 = arith.constant 0 : index
    %234 = vector.load %arg6[%c0_110, %c0_111] : memref<2x32xf32, #tpu.memory_space<vmem>>, vector<2x32xf32>
    tpu.vector_store %arg6[%c0_110, %c0_111], %204 {strides = array<i32>} : memref<2x32xf32, #tpu.memory_space<vmem>>, vector<2x32xf32>,
    %c0_112 = arith.constant 0 : index
    %c0_113 = arith.constant 0 : index
    %235 = vector.load %arg7[%c0_112, %c0_113] : memref<2x32xf32, #tpu.memory_space<vmem>>, vector<2x32xf32>
    tpu.vector_store %arg7[%c0_112, %c0_113], %232 {strides = array<i32>} : memref<2x32xf32, #tpu.memory_space<vmem>>, vector<2x32xf32>,
    %c0_114 = arith.constant 0 : index
    %c0_115 = arith.constant 0 : index
    %236 = vector.load %arg8[%c0_114, %c0_115] : memref<2x32xf32, #tpu.memory_space<vmem>>, vector<2x32xf32>
    tpu.vector_store %arg8[%c0_114, %c0_115], %230 {strides = array<i32>} : memref<2x32xf32, #tpu.memory_space<vmem>>, vector<2x32xf32>,
    %237 = arith.index_cast %c2_i32 : i32 to index
    %c0_116 = arith.constant 0 : index
    %c0_117 = arith.constant 0 : index
    %238 = vector.load %arg9[%237, %c0_116, %c0_117] : memref<8x2x32xf32, #tpu.memory_space<vmem>>, vector<1x2x32xf32>
    %239 = vector.shape_cast %238 : vector<1x2x32xf32> to vector<2x32xf32>
    %240 = vector.shape_cast %206 : vector<2x32xf32> to vector<1x2x32xf32>
    tpu.vector_store %arg9[%237, %c0_116, %c0_117], %240 {strides = array<i32>} : memref<8x2x32xf32, #tpu.memory_space<vmem>>, vector<1x2x32xf32>,
    %241 = arith.index_cast %166 : i32 to index
    %c0_118 = arith.constant 0 : index
    %c0_119 = arith.constant 0 : index
    %242 = vector.load %arg10[%241, %c0_118, %c0_119] : memref<8x2x32xf32, #tpu.memory_space<vmem>>, vector<1x2x32xf32>
    %243 = vector.shape_cast %242 : vector<1x2x32xf32> to vector<2x32xf32>
    %244 = vector.shape_cast %232 : vector<2x32xf32> to vector<1x2x32xf32>
    tpu.vector_store %arg10[%241, %c0_118, %c0_119], %244 {strides = array<i32>} : memref<8x2x32xf32, #tpu.memory_space<vmem>>, vector<1x2x32xf32>,
    %c3_i32 = arith.constant 3 : i32
    %c7_i32_120 = arith.constant 7 : i32
    %245 = arith.subi %c7_i32_120, %c3_i32 : i32
    %246 = arith.index_cast %c3_i32 : i32 to index
    %c0_121 = arith.constant 0 : index
    %c0_122 = arith.constant 0 : index
    %247 = vector.load %arg0[%246, %c0_121, %c0_122] : memref<8x2x128xf32, #tpu.memory_space<vmem>>, vector<1x2x128xf32>
    %248 = vector.shape_cast %247 : vector<1x2x128xf32> to vector<2x128xf32>
    %c0_123 = arith.constant 0 : index
    %c0_124 = arith.constant 0 : index
    %249 = vector.load %arg5[%c0_123, %c0_124] : memref<2x32xf32, #tpu.memory_space<vmem>>, vector<2x32xf32>
    %c0_125 = arith.constant 0 : index
    %c0_126 = arith.constant 0 : index
    %250 = vector.load %arg2[%c0_125, %c0_126] : memref<32x128xf32, #tpu.memory_space<vmem>>, vector<32x128xf32>
    %cst_127 = arith.constant dense<0.000000e+00> : vector<2x128xf32>
    %251 = tpu.matmul %249, %250, %cst_127 {dimension_numbers = #tpu.dot_dimension_numbers<[1], [0], [0], [1], [0, 0, 1, 1], [], []>} : vector<2x32xf32>, vector<32x128xf32>, vector<2x128xf32> -> vector<2x128xf32>
    %252 = arith.addf %248, %251 : vector<2x128xf32>
    %253 = arith.index_cast %245 : i32 to index
    %c0_128 = arith.constant 0 : index
    %c0_129 = arith.constant 0 : index
    %254 = vector.load %arg1[%253, %c0_128, %c0_129] : memref<8x2x128xf32, #tpu.memory_space<vmem>>, vector<1x2x128xf32>
    %255 = vector.shape_cast %254 : vector<1x2x128xf32> to vector<2x128xf32>
    %c0_130 = arith.constant 0 : index
    %c0_131 = arith.constant 0 : index
    %256 = vector.load %arg7[%c0_130, %c0_131] : memref<2x32xf32, #tpu.memory_space<vmem>>, vector<2x32xf32>
    %c0_132 = arith.constant 0 : index
    %c0_133 = arith.constant 0 : index
    %257 = vector.load %arg3[%c0_132, %c0_133] : memref<32x128xf32, #tpu.memory_space<vmem>>, vector<32x128xf32>
    %cst_134 = arith.constant dense<0.000000e+00> : vector<2x128xf32>
    %258 = tpu.matmul %256, %257, %cst_134 {dimension_numbers = #tpu.dot_dimension_numbers<[1], [0], [0], [1], [0, 0, 1, 1], [], []>} : vector<2x32xf32>, vector<32x128xf32>, vector<2x128xf32> -> vector<2x128xf32>
    %259 = arith.addf %255, %258 : vector<2x128xf32>
    %c0_135 = arith.constant 0 : index
    %c0_136 = arith.constant 0 : index
    %260 = vector.load %arg6[%c0_135, %c0_136] : memref<2x32xf32, #tpu.memory_space<vmem>>, vector<2x32xf32>
    %261 = vector.extract_strided_slice %252 {offsets = [0, 0], sizes = [2, 32], strides = [1, 1]} : vector<2x128xf32> to vector<2x32xf32>
    %262 = arith.negf %261 : vector<2x32xf32>
    %263 = math.exp %262 : vector<2x32xf32>
    %cst_137 = arith.constant 1.000000e+00 : f32
    %264 = vector.broadcast %cst_137 : f32 to vector<2x32xf32>
    %265 = arith.addf %264, %263 : vector<2x32xf32>
    %266 = arith.divf %264, %265 : vector<2x32xf32>
    %267 = vector.extract_strided_slice %252 {offsets = [0, 32], sizes = [2, 32], strides = [1, 1]} : vector<2x128xf32> to vector<2x32xf32>
    %268 = arith.negf %267 : vector<2x32xf32>
    %269 = math.exp %268 : vector<2x32xf32>
    %cst_138 = arith.constant 1.000000e+00 : f32
    %270 = vector.broadcast %cst_138 : f32 to vector<2x32xf32>
    %271 = arith.addf %270, %269 : vector<2x32xf32>
    %272 = arith.divf %270, %271 : vector<2x32xf32>
    %273 = vector.extract_strided_slice %252 {offsets = [0, 64], sizes = [2, 32], strides = [1, 1]} : vector<2x128xf32> to vector<2x32xf32>
    %274 = math.tanh %273 : vector<2x32xf32>
    %275 = vector.extract_strided_slice %252 {offsets = [0, 96], sizes = [2, 32], strides = [1, 1]} : vector<2x128xf32> to vector<2x32xf32>
    %276 = arith.negf %275 : vector<2x32xf32>
    %277 = math.exp %276 : vector<2x32xf32>
    %cst_139 = arith.constant 1.000000e+00 : f32
    %278 = vector.broadcast %cst_139 : f32 to vector<2x32xf32>
    %279 = arith.addf %278, %277 : vector<2x32xf32>
    %280 = arith.divf %278, %279 : vector<2x32xf32>
    %281 = arith.mulf %272, %260 : vector<2x32xf32>
    %282 = arith.mulf %266, %274 : vector<2x32xf32>
    %283 = arith.addf %281, %282 : vector<2x32xf32>
    %284 = math.tanh %283 : vector<2x32xf32>
    %285 = arith.mulf %280, %284 : vector<2x32xf32>
    %c0_140 = arith.constant 0 : index
    %c0_141 = arith.constant 0 : index
    %286 = vector.load %arg8[%c0_140, %c0_141] : memref<2x32xf32, #tpu.memory_space<vmem>>, vector<2x32xf32>
    %287 = vector.extract_strided_slice %259 {offsets = [0, 0], sizes = [2, 32], strides = [1, 1]} : vector<2x128xf32> to vector<2x32xf32>
    %288 = arith.negf %287 : vector<2x32xf32>
    %289 = math.exp %288 : vector<2x32xf32>
    %cst_142 = arith.constant 1.000000e+00 : f32
    %290 = vector.broadcast %cst_142 : f32 to vector<2x32xf32>
    %291 = arith.addf %290, %289 : vector<2x32xf32>
    %292 = arith.divf %290, %291 : vector<2x32xf32>
    %293 = vector.extract_strided_slice %259 {offsets = [0, 32], sizes = [2, 32], strides = [1, 1]} : vector<2x128xf32> to vector<2x32xf32>
    %294 = arith.negf %293 : vector<2x32xf32>
    %295 = math.exp %294 : vector<2x32xf32>
    %cst_143 = arith.constant 1.000000e+00 : f32
    %296 = vector.broadcast %cst_143 : f32 to vector<2x32xf32>
    %297 = arith.addf %296, %295 : vector<2x32xf32>
    %298 = arith.divf %296, %297 : vector<2x32xf32>
    %299 = vector.extract_strided_slice %259 {offsets = [0, 64], sizes = [2, 32], strides = [1, 1]} : vector<2x128xf32> to vector<2x32xf32>
    %300 = math.tanh %299 : vector<2x32xf32>
    %301 = vector.extract_strided_slice %259 {offsets = [0, 96], sizes = [2, 32], strides = [1, 1]} : vector<2x128xf32> to vector<2x32xf32>
    %302 = arith.negf %301 : vector<2x32xf32>
    %303 = math.exp %302 : vector<2x32xf32>
    %cst_144 = arith.constant 1.000000e+00 : f32
    %304 = vector.broadcast %cst_144 : f32 to vector<2x32xf32>
    %305 = arith.addf %304, %303 : vector<2x32xf32>
    %306 = arith.divf %304, %305 : vector<2x32xf32>
    %307 = arith.mulf %298, %286 : vector<2x32xf32>
    %308 = arith.mulf %292, %300 : vector<2x32xf32>
    %309 = arith.addf %307, %308 : vector<2x32xf32>
    %310 = math.tanh %309 : vector<2x32xf32>
    %311 = arith.mulf %306, %310 : vector<2x32xf32>
    %c0_145 = arith.constant 0 : index
    %c0_146 = arith.constant 0 : index
    %312 = vector.load %arg5[%c0_145, %c0_146] : memref<2x32xf32, #tpu.memory_space<vmem>>, vector<2x32xf32>
    tpu.vector_store %arg5[%c0_145, %c0_146], %285 {strides = array<i32>} : memref<2x32xf32, #tpu.memory_space<vmem>>, vector<2x32xf32>,
    %c0_147 = arith.constant 0 : index
    %c0_148 = arith.constant 0 : index
    %313 = vector.load %arg6[%c0_147, %c0_148] : memref<2x32xf32, #tpu.memory_space<vmem>>, vector<2x32xf32>
    tpu.vector_store %arg6[%c0_147, %c0_148], %283 {strides = array<i32>} : memref<2x32xf32, #tpu.memory_space<vmem>>, vector<2x32xf32>,
    %c0_149 = arith.constant 0 : index
    %c0_150 = arith.constant 0 : index
    %314 = vector.load %arg7[%c0_149, %c0_150] : memref<2x32xf32, #tpu.memory_space<vmem>>, vector<2x32xf32>
    tpu.vector_store %arg7[%c0_149, %c0_150], %311 {strides = array<i32>} : memref<2x32xf32, #tpu.memory_space<vmem>>, vector<2x32xf32>,
    %c0_151 = arith.constant 0 : index
    %c0_152 = arith.constant 0 : index
    %315 = vector.load %arg8[%c0_151, %c0_152] : memref<2x32xf32, #tpu.memory_space<vmem>>, vector<2x32xf32>
    tpu.vector_store %arg8[%c0_151, %c0_152], %309 {strides = array<i32>} : memref<2x32xf32, #tpu.memory_space<vmem>>, vector<2x32xf32>,
    %316 = arith.index_cast %c3_i32 : i32 to index
    %c0_153 = arith.constant 0 : index
    %c0_154 = arith.constant 0 : index
    %317 = vector.load %arg9[%316, %c0_153, %c0_154] : memref<8x2x32xf32, #tpu.memory_space<vmem>>, vector<1x2x32xf32>
    %318 = vector.shape_cast %317 : vector<1x2x32xf32> to vector<2x32xf32>
    %319 = vector.shape_cast %285 : vector<2x32xf32> to vector<1x2x32xf32>
    tpu.vector_store %arg9[%316, %c0_153, %c0_154], %319 {strides = array<i32>} : memref<8x2x32xf32, #tpu.memory_space<vmem>>, vector<1x2x32xf32>,
    %320 = arith.index_cast %245 : i32 to index
    %c0_155 = arith.constant 0 : index
    %c0_156 = arith.constant 0 : index
    %321 = vector.load %arg10[%320, %c0_155, %c0_156] : memref<8x2x32xf32, #tpu.memory_space<vmem>>, vector<1x2x32xf32>
    %322 = vector.shape_cast %321 : vector<1x2x32xf32> to vector<2x32xf32>
    %323 = vector.shape_cast %311 : vector<2x32xf32> to vector<1x2x32xf32>
    tpu.vector_store %arg10[%320, %c0_155, %c0_156], %323 {strides = array<i32>} : memref<8x2x32xf32, #tpu.memory_space<vmem>>, vector<1x2x32xf32>,
    %c4_i32 = arith.constant 4 : i32
    %c7_i32_157 = arith.constant 7 : i32
    %324 = arith.subi %c7_i32_157, %c4_i32 : i32
    %325 = arith.index_cast %c4_i32 : i32 to index
    %c0_158 = arith.constant 0 : index
    %c0_159 = arith.constant 0 : index
    %326 = vector.load %arg0[%325, %c0_158, %c0_159] : memref<8x2x128xf32, #tpu.memory_space<vmem>>, vector<1x2x128xf32>
    %327 = vector.shape_cast %326 : vector<1x2x128xf32> to vector<2x128xf32>
    %c0_160 = arith.constant 0 : index
    %c0_161 = arith.constant 0 : index
    %328 = vector.load %arg5[%c0_160, %c0_161] : memref<2x32xf32, #tpu.memory_space<vmem>>, vector<2x32xf32>
    %c0_162 = arith.constant 0 : index
    %c0_163 = arith.constant 0 : index
    %329 = vector.load %arg2[%c0_162, %c0_163] : memref<32x128xf32, #tpu.memory_space<vmem>>, vector<32x128xf32>
    %cst_164 = arith.constant dense<0.000000e+00> : vector<2x128xf32>
    %330 = tpu.matmul %328, %329, %cst_164 {dimension_numbers = #tpu.dot_dimension_numbers<[1], [0], [0], [1], [0, 0, 1, 1], [], []>} : vector<2x32xf32>, vector<32x128xf32>, vector<2x128xf32> -> vector<2x128xf32>
    %331 = arith.addf %327, %330 : vector<2x128xf32>
    %332 = arith.index_cast %324 : i32 to index
    %c0_165 = arith.constant 0 : index
    %c0_166 = arith.constant 0 : index
    %333 = vector.load %arg1[%332, %c0_165, %c0_166] : memref<8x2x128xf32, #tpu.memory_space<vmem>>, vector<1x2x128xf32>
    %334 = vector.shape_cast %333 : vector<1x2x128xf32> to vector<2x128xf32>
    %c0_167 = arith.constant 0 : index
    %c0_168 = arith.constant 0 : index
    %335 = vector.load %arg7[%c0_167, %c0_168] : memref<2x32xf32, #tpu.memory_space<vmem>>, vector<2x32xf32>
    %c0_169 = arith.constant 0 : index
    %c0_170 = arith.constant 0 : index
    %336 = vector.load %arg3[%c0_169, %c0_170] : memref<32x128xf32, #tpu.memory_space<vmem>>, vector<32x128xf32>
    %cst_171 = arith.constant dense<0.000000e+00> : vector<2x128xf32>
    %337 = tpu.matmul %335, %336, %cst_171 {dimension_numbers = #tpu.dot_dimension_numbers<[1], [0], [0], [1], [0, 0, 1, 1], [], []>} : vector<2x32xf32>, vector<32x128xf32>, vector<2x128xf32> -> vector<2x128xf32>
    %338 = arith.addf %334, %337 : vector<2x128xf32>
    %c0_172 = arith.constant 0 : index
    %c0_173 = arith.constant 0 : index
    %339 = vector.load %arg6[%c0_172, %c0_173] : memref<2x32xf32, #tpu.memory_space<vmem>>, vector<2x32xf32>
    %340 = vector.extract_strided_slice %331 {offsets = [0, 0], sizes = [2, 32], strides = [1, 1]} : vector<2x128xf32> to vector<2x32xf32>
    %341 = arith.negf %340 : vector<2x32xf32>
    %342 = math.exp %341 : vector<2x32xf32>
    %cst_174 = arith.constant 1.000000e+00 : f32
    %343 = vector.broadcast %cst_174 : f32 to vector<2x32xf32>
    %344 = arith.addf %343, %342 : vector<2x32xf32>
    %345 = arith.divf %343, %344 : vector<2x32xf32>
    %346 = vector.extract_strided_slice %331 {offsets = [0, 32], sizes = [2, 32], strides = [1, 1]} : vector<2x128xf32> to vector<2x32xf32>
    %347 = arith.negf %346 : vector<2x32xf32>
    %348 = math.exp %347 : vector<2x32xf32>
    %cst_175 = arith.constant 1.000000e+00 : f32
    %349 = vector.broadcast %cst_175 : f32 to vector<2x32xf32>
    %350 = arith.addf %349, %348 : vector<2x32xf32>
    %351 = arith.divf %349, %350 : vector<2x32xf32>
    %352 = vector.extract_strided_slice %331 {offsets = [0, 64], sizes = [2, 32], strides = [1, 1]} : vector<2x128xf32> to vector<2x32xf32>
    %353 = math.tanh %352 : vector<2x32xf32>
    %354 = vector.extract_strided_slice %331 {offsets = [0, 96], sizes = [2, 32], strides = [1, 1]} : vector<2x128xf32> to vector<2x32xf32>
    %355 = arith.negf %354 : vector<2x32xf32>
    %356 = math.exp %355 : vector<2x32xf32>
    %cst_176 = arith.constant 1.000000e+00 : f32
    %357 = vector.broadcast %cst_176 : f32 to vector<2x32xf32>
    %358 = arith.addf %357, %356 : vector<2x32xf32>
    %359 = arith.divf %357, %358 : vector<2x32xf32>
    %360 = arith.mulf %351, %339 : vector<2x32xf32>
    %361 = arith.mulf %345, %353 : vector<2x32xf32>
    %362 = arith.addf %360, %361 : vector<2x32xf32>
    %363 = math.tanh %362 : vector<2x32xf32>
    %364 = arith.mulf %359, %363 : vector<2x32xf32>
    %c0_177 = arith.constant 0 : index
    %c0_178 = arith.constant 0 : index
    %365 = vector.load %arg8[%c0_177, %c0_178] : memref<2x32xf32, #tpu.memory_space<vmem>>, vector<2x32xf32>
    %366 = vector.extract_strided_slice %338 {offsets = [0, 0], sizes = [2, 32], strides = [1, 1]} : vector<2x128xf32> to vector<2x32xf32>
    %367 = arith.negf %366 : vector<2x32xf32>
    %368 = math.exp %367 : vector<2x32xf32>
    %cst_179 = arith.constant 1.000000e+00 : f32
    %369 = vector.broadcast %cst_179 : f32 to vector<2x32xf32>
    %370 = arith.addf %369, %368 : vector<2x32xf32>
    %371 = arith.divf %369, %370 : vector<2x32xf32>
    %372 = vector.extract_strided_slice %338 {offsets = [0, 32], sizes = [2, 32], strides = [1, 1]} : vector<2x128xf32> to vector<2x32xf32>
    %373 = arith.negf %372 : vector<2x32xf32>
    %374 = math.exp %373 : vector<2x32xf32>
    %cst_180 = arith.constant 1.000000e+00 : f32
    %375 = vector.broadcast %cst_180 : f32 to vector<2x32xf32>
    %376 = arith.addf %375, %374 : vector<2x32xf32>
    %377 = arith.divf %375, %376 : vector<2x32xf32>
    %378 = vector.extract_strided_slice %338 {offsets = [0, 64], sizes = [2, 32], strides = [1, 1]} : vector<2x128xf32> to vector<2x32xf32>
    %379 = math.tanh %378 : vector<2x32xf32>
    %380 = vector.extract_strided_slice %338 {offsets = [0, 96], sizes = [2, 32], strides = [1, 1]} : vector<2x128xf32> to vector<2x32xf32>
    %381 = arith.negf %380 : vector<2x32xf32>
    %382 = math.exp %381 : vector<2x32xf32>
    %cst_181 = arith.constant 1.000000e+00 : f32
    %383 = vector.broadcast %cst_181 : f32 to vector<2x32xf32>
    %384 = arith.addf %383, %382 : vector<2x32xf32>
    %385 = arith.divf %383, %384 : vector<2x32xf32>
    %386 = arith.mulf %377, %365 : vector<2x32xf32>
    %387 = arith.mulf %371, %379 : vector<2x32xf32>
    %388 = arith.addf %386, %387 : vector<2x32xf32>
    %389 = math.tanh %388 : vector<2x32xf32>
    %390 = arith.mulf %385, %389 : vector<2x32xf32>
    %c0_182 = arith.constant 0 : index
    %c0_183 = arith.constant 0 : index
    %391 = vector.load %arg5[%c0_182, %c0_183] : memref<2x32xf32, #tpu.memory_space<vmem>>, vector<2x32xf32>
    tpu.vector_store %arg5[%c0_182, %c0_183], %364 {strides = array<i32>} : memref<2x32xf32, #tpu.memory_space<vmem>>, vector<2x32xf32>,
    %c0_184 = arith.constant 0 : index
    %c0_185 = arith.constant 0 : index
    %392 = vector.load %arg6[%c0_184, %c0_185] : memref<2x32xf32, #tpu.memory_space<vmem>>, vector<2x32xf32>
    tpu.vector_store %arg6[%c0_184, %c0_185], %362 {strides = array<i32>} : memref<2x32xf32, #tpu.memory_space<vmem>>, vector<2x32xf32>,
    %c0_186 = arith.constant 0 : index
    %c0_187 = arith.constant 0 : index
    %393 = vector.load %arg7[%c0_186, %c0_187] : memref<2x32xf32, #tpu.memory_space<vmem>>, vector<2x32xf32>
    tpu.vector_store %arg7[%c0_186, %c0_187], %390 {strides = array<i32>} : memref<2x32xf32, #tpu.memory_space<vmem>>, vector<2x32xf32>,
    %c0_188 = arith.constant 0 : index
    %c0_189 = arith.constant 0 : index
    %394 = vector.load %arg8[%c0_188, %c0_189] : memref<2x32xf32, #tpu.memory_space<vmem>>, vector<2x32xf32>
    tpu.vector_store %arg8[%c0_188, %c0_189], %388 {strides = array<i32>} : memref<2x32xf32, #tpu.memory_space<vmem>>, vector<2x32xf32>,
    %395 = arith.index_cast %c4_i32 : i32 to index
    %c0_190 = arith.constant 0 : index
    %c0_191 = arith.constant 0 : index
    %396 = vector.load %arg9[%395, %c0_190, %c0_191] : memref<8x2x32xf32, #tpu.memory_space<vmem>>, vector<1x2x32xf32>
    %397 = vector.shape_cast %396 : vector<1x2x32xf32> to vector<2x32xf32>
    %398 = vector.shape_cast %364 : vector<2x32xf32> to vector<1x2x32xf32>
    tpu.vector_store %arg9[%395, %c0_190, %c0_191], %398 {strides = array<i32>} : memref<8x2x32xf32, #tpu.memory_space<vmem>>, vector<1x2x32xf32>,
    %399 = arith.index_cast %324 : i32 to index
    %c0_192 = arith.constant 0 : index
    %c0_193 = arith.constant 0 : index
    %400 = vector.load %arg10[%399, %c0_192, %c0_193] : memref<8x2x32xf32, #tpu.memory_space<vmem>>, vector<1x2x32xf32>
    %401 = vector.shape_cast %400 : vector<1x2x32xf32> to vector<2x32xf32>
    %402 = vector.shape_cast %390 : vector<2x32xf32> to vector<1x2x32xf32>
    tpu.vector_store %arg10[%399, %c0_192, %c0_193], %402 {strides = array<i32>} : memref<8x2x32xf32, #tpu.memory_space<vmem>>, vector<1x2x32xf32>,
    %c5_i32 = arith.constant 5 : i32
    %c7_i32_194 = arith.constant 7 : i32
    %403 = arith.subi %c7_i32_194, %c5_i32 : i32
    %404 = arith.index_cast %c5_i32 : i32 to index
    %c0_195 = arith.constant 0 : index
    %c0_196 = arith.constant 0 : index
    %405 = vector.load %arg0[%404, %c0_195, %c0_196] : memref<8x2x128xf32, #tpu.memory_space<vmem>>, vector<1x2x128xf32>
    %406 = vector.shape_cast %405 : vector<1x2x128xf32> to vector<2x128xf32>
    %c0_197 = arith.constant 0 : index
    %c0_198 = arith.constant 0 : index
    %407 = vector.load %arg5[%c0_197, %c0_198] : memref<2x32xf32, #tpu.memory_space<vmem>>, vector<2x32xf32>
    %c0_199 = arith.constant 0 : index
    %c0_200 = arith.constant 0 : index
    %408 = vector.load %arg2[%c0_199, %c0_200] : memref<32x128xf32, #tpu.memory_space<vmem>>, vector<32x128xf32>
    %cst_201 = arith.constant dense<0.000000e+00> : vector<2x128xf32>
    %409 = tpu.matmul %407, %408, %cst_201 {dimension_numbers = #tpu.dot_dimension_numbers<[1], [0], [0], [1], [0, 0, 1, 1], [], []>} : vector<2x32xf32>, vector<32x128xf32>, vector<2x128xf32> -> vector<2x128xf32>
    %410 = arith.addf %406, %409 : vector<2x128xf32>
    %411 = arith.index_cast %403 : i32 to index
    %c0_202 = arith.constant 0 : index
    %c0_203 = arith.constant 0 : index
    %412 = vector.load %arg1[%411, %c0_202, %c0_203] : memref<8x2x128xf32, #tpu.memory_space<vmem>>, vector<1x2x128xf32>
    %413 = vector.shape_cast %412 : vector<1x2x128xf32> to vector<2x128xf32>
    %c0_204 = arith.constant 0 : index
    %c0_205 = arith.constant 0 : index
    %414 = vector.load %arg7[%c0_204, %c0_205] : memref<2x32xf32, #tpu.memory_space<vmem>>, vector<2x32xf32>
    %c0_206 = arith.constant 0 : index
    %c0_207 = arith.constant 0 : index
    %415 = vector.load %arg3[%c0_206, %c0_207] : memref<32x128xf32, #tpu.memory_space<vmem>>, vector<32x128xf32>
    %cst_208 = arith.constant dense<0.000000e+00> : vector<2x128xf32>
    %416 = tpu.matmul %414, %415, %cst_208 {dimension_numbers = #tpu.dot_dimension_numbers<[1], [0], [0], [1], [0, 0, 1, 1], [], []>} : vector<2x32xf32>, vector<32x128xf32>, vector<2x128xf32> -> vector<2x128xf32>
    %417 = arith.addf %413, %416 : vector<2x128xf32>
    %c0_209 = arith.constant 0 : index
    %c0_210 = arith.constant 0 : index
    %418 = vector.load %arg6[%c0_209, %c0_210] : memref<2x32xf32, #tpu.memory_space<vmem>>, vector<2x32xf32>
    %419 = vector.extract_strided_slice %410 {offsets = [0, 0], sizes = [2, 32], strides = [1, 1]} : vector<2x128xf32> to vector<2x32xf32>
    %420 = arith.negf %419 : vector<2x32xf32>
    %421 = math.exp %420 : vector<2x32xf32>
    %cst_211 = arith.constant 1.000000e+00 : f32
    %422 = vector.broadcast %cst_211 : f32 to vector<2x32xf32>
    %423 = arith.addf %422, %421 : vector<2x32xf32>
    %424 = arith.divf %422, %423 : vector<2x32xf32>
    %425 = vector.extract_strided_slice %410 {offsets = [0, 32], sizes = [2, 32], strides = [1, 1]} : vector<2x128xf32> to vector<2x32xf32>
    %426 = arith.negf %425 : vector<2x32xf32>
    %427 = math.exp %426 : vector<2x32xf32>
    %cst_212 = arith.constant 1.000000e+00 : f32
    %428 = vector.broadcast %cst_212 : f32 to vector<2x32xf32>
    %429 = arith.addf %428, %427 : vector<2x32xf32>
    %430 = arith.divf %428, %429 : vector<2x32xf32>
    %431 = vector.extract_strided_slice %410 {offsets = [0, 64], sizes = [2, 32], strides = [1, 1]} : vector<2x128xf32> to vector<2x32xf32>
    %432 = math.tanh %431 : vector<2x32xf32>
    %433 = vector.extract_strided_slice %410 {offsets = [0, 96], sizes = [2, 32], strides = [1, 1]} : vector<2x128xf32> to vector<2x32xf32>
    %434 = arith.negf %433 : vector<2x32xf32>
    %435 = math.exp %434 : vector<2x32xf32>
    %cst_213 = arith.constant 1.000000e+00 : f32
    %436 = vector.broadcast %cst_213 : f32 to vector<2x32xf32>
    %437 = arith.addf %436, %435 : vector<2x32xf32>
    %438 = arith.divf %436, %437 : vector<2x32xf32>
    %439 = arith.mulf %430, %418 : vector<2x32xf32>
    %440 = arith.mulf %424, %432 : vector<2x32xf32>
    %441 = arith.addf %439, %440 : vector<2x32xf32>
    %442 = math.tanh %441 : vector<2x32xf32>
    %443 = arith.mulf %438, %442 : vector<2x32xf32>
    %c0_214 = arith.constant 0 : index
    %c0_215 = arith.constant 0 : index
    %444 = vector.load %arg8[%c0_214, %c0_215] : memref<2x32xf32, #tpu.memory_space<vmem>>, vector<2x32xf32>
    %445 = vector.extract_strided_slice %417 {offsets = [0, 0], sizes = [2, 32], strides = [1, 1]} : vector<2x128xf32> to vector<2x32xf32>
    %446 = arith.negf %445 : vector<2x32xf32>
    %447 = math.exp %446 : vector<2x32xf32>
    %cst_216 = arith.constant 1.000000e+00 : f32
    %448 = vector.broadcast %cst_216 : f32 to vector<2x32xf32>
    %449 = arith.addf %448, %447 : vector<2x32xf32>
    %450 = arith.divf %448, %449 : vector<2x32xf32>
    %451 = vector.extract_strided_slice %417 {offsets = [0, 32], sizes = [2, 32], strides = [1, 1]} : vector<2x128xf32> to vector<2x32xf32>
    %452 = arith.negf %451 : vector<2x32xf32>
    %453 = math.exp %452 : vector<2x32xf32>
    %cst_217 = arith.constant 1.000000e+00 : f32
    %454 = vector.broadcast %cst_217 : f32 to vector<2x32xf32>
    %455 = arith.addf %454, %453 : vector<2x32xf32>
    %456 = arith.divf %454, %455 : vector<2x32xf32>
    %457 = vector.extract_strided_slice %417 {offsets = [0, 64], sizes = [2, 32], strides = [1, 1]} : vector<2x128xf32> to vector<2x32xf32>
    %458 = math.tanh %457 : vector<2x32xf32>
    %459 = vector.extract_strided_slice %417 {offsets = [0, 96], sizes = [2, 32], strides = [1, 1]} : vector<2x128xf32> to vector<2x32xf32>
    %460 = arith.negf %459 : vector<2x32xf32>
    %461 = math.exp %460 : vector<2x32xf32>
    %cst_218 = arith.constant 1.000000e+00 : f32
    %462 = vector.broadcast %cst_218 : f32 to vector<2x32xf32>
    %463 = arith.addf %462, %461 : vector<2x32xf32>
    %464 = arith.divf %462, %463 : vector<2x32xf32>
    %465 = arith.mulf %456, %444 : vector<2x32xf32>
    %466 = arith.mulf %450, %458 : vector<2x32xf32>
    %467 = arith.addf %465, %466 : vector<2x32xf32>
    %468 = math.tanh %467 : vector<2x32xf32>
    %469 = arith.mulf %464, %468 : vector<2x32xf32>
    %c0_219 = arith.constant 0 : index
    %c0_220 = arith.constant 0 : index
    %470 = vector.load %arg5[%c0_219, %c0_220] : memref<2x32xf32, #tpu.memory_space<vmem>>, vector<2x32xf32>
    tpu.vector_store %arg5[%c0_219, %c0_220], %443 {strides = array<i32>} : memref<2x32xf32, #tpu.memory_space<vmem>>, vector<2x32xf32>,
    %c0_221 = arith.constant 0 : index
    %c0_222 = arith.constant 0 : index
    %471 = vector.load %arg6[%c0_221, %c0_222] : memref<2x32xf32, #tpu.memory_space<vmem>>, vector<2x32xf32>
    tpu.vector_store %arg6[%c0_221, %c0_222], %441 {strides = array<i32>} : memref<2x32xf32, #tpu.memory_space<vmem>>, vector<2x32xf32>,
    %c0_223 = arith.constant 0 : index
    %c0_224 = arith.constant 0 : index
    %472 = vector.load %arg7[%c0_223, %c0_224] : memref<2x32xf32, #tpu.memory_space<vmem>>, vector<2x32xf32>
    tpu.vector_store %arg7[%c0_223, %c0_224], %469 {strides = array<i32>} : memref<2x32xf32, #tpu.memory_space<vmem>>, vector<2x32xf32>,
    %c0_225 = arith.constant 0 : index
    %c0_226 = arith.constant 0 : index
    %473 = vector.load %arg8[%c0_225, %c0_226] : memref<2x32xf32, #tpu.memory_space<vmem>>, vector<2x32xf32>
    tpu.vector_store %arg8[%c0_225, %c0_226], %467 {strides = array<i32>} : memref<2x32xf32, #tpu.memory_space<vmem>>, vector<2x32xf32>,
    %474 = arith.index_cast %c5_i32 : i32 to index
    %c0_227 = arith.constant 0 : index
    %c0_228 = arith.constant 0 : index
    %475 = vector.load %arg9[%474, %c0_227, %c0_228] : memref<8x2x32xf32, #tpu.memory_space<vmem>>, vector<1x2x32xf32>
    %476 = vector.shape_cast %475 : vector<1x2x32xf32> to vector<2x32xf32>
    %477 = vector.shape_cast %443 : vector<2x32xf32> to vector<1x2x32xf32>
    tpu.vector_store %arg9[%474, %c0_227, %c0_228], %477 {strides = array<i32>} : memref<8x2x32xf32, #tpu.memory_space<vmem>>, vector<1x2x32xf32>,
    %478 = arith.index_cast %403 : i32 to index
    %c0_229 = arith.constant 0 : index
    %c0_230 = arith.constant 0 : index
    %479 = vector.load %arg10[%478, %c0_229, %c0_230] : memref<8x2x32xf32, #tpu.memory_space<vmem>>, vector<1x2x32xf32>
    %480 = vector.shape_cast %479 : vector<1x2x32xf32> to vector<2x32xf32>
    %481 = vector.shape_cast %469 : vector<2x32xf32> to vector<1x2x32xf32>
    tpu.vector_store %arg10[%478, %c0_229, %c0_230], %481 {strides = array<i32>} : memref<8x2x32xf32, #tpu.memory_space<vmem>>, vector<1x2x32xf32>,
    %c6_i32 = arith.constant 6 : i32
    %c7_i32_231 = arith.constant 7 : i32
    %482 = arith.subi %c7_i32_231, %c6_i32 : i32
    %483 = arith.index_cast %c6_i32 : i32 to index
    %c0_232 = arith.constant 0 : index
    %c0_233 = arith.constant 0 : index
    %484 = vector.load %arg0[%483, %c0_232, %c0_233] : memref<8x2x128xf32, #tpu.memory_space<vmem>>, vector<1x2x128xf32>
    %485 = vector.shape_cast %484 : vector<1x2x128xf32> to vector<2x128xf32>
    %c0_234 = arith.constant 0 : index
    %c0_235 = arith.constant 0 : index
    %486 = vector.load %arg5[%c0_234, %c0_235] : memref<2x32xf32, #tpu.memory_space<vmem>>, vector<2x32xf32>
    %c0_236 = arith.constant 0 : index
    %c0_237 = arith.constant 0 : index
    %487 = vector.load %arg2[%c0_236, %c0_237] : memref<32x128xf32, #tpu.memory_space<vmem>>, vector<32x128xf32>
    %cst_238 = arith.constant dense<0.000000e+00> : vector<2x128xf32>
    %488 = tpu.matmul %486, %487, %cst_238 {dimension_numbers = #tpu.dot_dimension_numbers<[1], [0], [0], [1], [0, 0, 1, 1], [], []>} : vector<2x32xf32>, vector<32x128xf32>, vector<2x128xf32> -> vector<2x128xf32>
    %489 = arith.addf %485, %488 : vector<2x128xf32>
    %490 = arith.index_cast %482 : i32 to index
    %c0_239 = arith.constant 0 : index
    %c0_240 = arith.constant 0 : index
    %491 = vector.load %arg1[%490, %c0_239, %c0_240] : memref<8x2x128xf32, #tpu.memory_space<vmem>>, vector<1x2x128xf32>
    %492 = vector.shape_cast %491 : vector<1x2x128xf32> to vector<2x128xf32>
    %c0_241 = arith.constant 0 : index
    %c0_242 = arith.constant 0 : index
    %493 = vector.load %arg7[%c0_241, %c0_242] : memref<2x32xf32, #tpu.memory_space<vmem>>, vector<2x32xf32>
    %c0_243 = arith.constant 0 : index
    %c0_244 = arith.constant 0 : index
    %494 = vector.load %arg3[%c0_243, %c0_244] : memref<32x128xf32, #tpu.memory_space<vmem>>, vector<32x128xf32>
    %cst_245 = arith.constant dense<0.000000e+00> : vector<2x128xf32>
    %495 = tpu.matmul %493, %494, %cst_245 {dimension_numbers = #tpu.dot_dimension_numbers<[1], [0], [0], [1], [0, 0, 1, 1], [], []>} : vector<2x32xf32>, vector<32x128xf32>, vector<2x128xf32> -> vector<2x128xf32>
    %496 = arith.addf %492, %495 : vector<2x128xf32>
    %c0_246 = arith.constant 0 : index
    %c0_247 = arith.constant 0 : index
    %497 = vector.load %arg6[%c0_246, %c0_247] : memref<2x32xf32, #tpu.memory_space<vmem>>, vector<2x32xf32>
    %498 = vector.extract_strided_slice %489 {offsets = [0, 0], sizes = [2, 32], strides = [1, 1]} : vector<2x128xf32> to vector<2x32xf32>
    %499 = arith.negf %498 : vector<2x32xf32>
    %500 = math.exp %499 : vector<2x32xf32>
    %cst_248 = arith.constant 1.000000e+00 : f32
    %501 = vector.broadcast %cst_248 : f32 to vector<2x32xf32>
    %502 = arith.addf %501, %500 : vector<2x32xf32>
    %503 = arith.divf %501, %502 : vector<2x32xf32>
    %504 = vector.extract_strided_slice %489 {offsets = [0, 32], sizes = [2, 32], strides = [1, 1]} : vector<2x128xf32> to vector<2x32xf32>
    %505 = arith.negf %504 : vector<2x32xf32>
    %506 = math.exp %505 : vector<2x32xf32>
    %cst_249 = arith.constant 1.000000e+00 : f32
    %507 = vector.broadcast %cst_249 : f32 to vector<2x32xf32>
    %508 = arith.addf %507, %506 : vector<2x32xf32>
    %509 = arith.divf %507, %508 : vector<2x32xf32>
    %510 = vector.extract_strided_slice %489 {offsets = [0, 64], sizes = [2, 32], strides = [1, 1]} : vector<2x128xf32> to vector<2x32xf32>
    %511 = math.tanh %510 : vector<2x32xf32>
    %512 = vector.extract_strided_slice %489 {offsets = [0, 96], sizes = [2, 32], strides = [1, 1]} : vector<2x128xf32> to vector<2x32xf32>
    %513 = arith.negf %512 : vector<2x32xf32>
    %514 = math.exp %513 : vector<2x32xf32>
    %cst_250 = arith.constant 1.000000e+00 : f32
    %515 = vector.broadcast %cst_250 : f32 to vector<2x32xf32>
    %516 = arith.addf %515, %514 : vector<2x32xf32>
    %517 = arith.divf %515, %516 : vector<2x32xf32>
    %518 = arith.mulf %509, %497 : vector<2x32xf32>
    %519 = arith.mulf %503, %511 : vector<2x32xf32>
    %520 = arith.addf %518, %519 : vector<2x32xf32>
    %521 = math.tanh %520 : vector<2x32xf32>
    %522 = arith.mulf %517, %521 : vector<2x32xf32>
    %c0_251 = arith.constant 0 : index
    %c0_252 = arith.constant 0 : index
    %523 = vector.load %arg8[%c0_251, %c0_252] : memref<2x32xf32, #tpu.memory_space<vmem>>, vector<2x32xf32>
    %524 = vector.extract_strided_slice %496 {offsets = [0, 0], sizes = [2, 32], strides = [1, 1]} : vector<2x128xf32> to vector<2x32xf32>
    %525 = arith.negf %524 : vector<2x32xf32>
    %526 = math.exp %525 : vector<2x32xf32>
    %cst_253 = arith.constant 1.000000e+00 : f32
    %527 = vector.broadcast %cst_253 : f32 to vector<2x32xf32>
    %528 = arith.addf %527, %526 : vector<2x32xf32>
    %529 = arith.divf %527, %528 : vector<2x32xf32>
    %530 = vector.extract_strided_slice %496 {offsets = [0, 32], sizes = [2, 32], strides = [1, 1]} : vector<2x128xf32> to vector<2x32xf32>
    %531 = arith.negf %530 : vector<2x32xf32>
    %532 = math.exp %531 : vector<2x32xf32>
    %cst_254 = arith.constant 1.000000e+00 : f32
    %533 = vector.broadcast %cst_254 : f32 to vector<2x32xf32>
    %534 = arith.addf %533, %532 : vector<2x32xf32>
    %535 = arith.divf %533, %534 : vector<2x32xf32>
    %536 = vector.extract_strided_slice %496 {offsets = [0, 64], sizes = [2, 32], strides = [1, 1]} : vector<2x128xf32> to vector<2x32xf32>
    %537 = math.tanh %536 : vector<2x32xf32>
    %538 = vector.extract_strided_slice %496 {offsets = [0, 96], sizes = [2, 32], strides = [1, 1]} : vector<2x128xf32> to vector<2x32xf32>
    %539 = arith.negf %538 : vector<2x32xf32>
    %540 = math.exp %539 : vector<2x32xf32>
    %cst_255 = arith.constant 1.000000e+00 : f32
    %541 = vector.broadcast %cst_255 : f32 to vector<2x32xf32>
    %542 = arith.addf %541, %540 : vector<2x32xf32>
    %543 = arith.divf %541, %542 : vector<2x32xf32>
    %544 = arith.mulf %535, %523 : vector<2x32xf32>
    %545 = arith.mulf %529, %537 : vector<2x32xf32>
    %546 = arith.addf %544, %545 : vector<2x32xf32>
    %547 = math.tanh %546 : vector<2x32xf32>
    %548 = arith.mulf %543, %547 : vector<2x32xf32>
    %c0_256 = arith.constant 0 : index
    %c0_257 = arith.constant 0 : index
    %549 = vector.load %arg5[%c0_256, %c0_257] : memref<2x32xf32, #tpu.memory_space<vmem>>, vector<2x32xf32>
    tpu.vector_store %arg5[%c0_256, %c0_257], %522 {strides = array<i32>} : memref<2x32xf32, #tpu.memory_space<vmem>>, vector<2x32xf32>,
    %c0_258 = arith.constant 0 : index
    %c0_259 = arith.constant 0 : index
    %550 = vector.load %arg6[%c0_258, %c0_259] : memref<2x32xf32, #tpu.memory_space<vmem>>, vector<2x32xf32>
    tpu.vector_store %arg6[%c0_258, %c0_259], %520 {strides = array<i32>} : memref<2x32xf32, #tpu.memory_space<vmem>>, vector<2x32xf32>,
    %c0_260 = arith.constant 0 : index
    %c0_261 = arith.constant 0 : index
    %551 = vector.load %arg7[%c0_260, %c0_261] : memref<2x32xf32, #tpu.memory_space<vmem>>, vector<2x32xf32>
    tpu.vector_store %arg7[%c0_260, %c0_261], %548 {strides = array<i32>} : memref<2x32xf32, #tpu.memory_space<vmem>>, vector<2x32xf32>,
    %c0_262 = arith.constant 0 : index
    %c0_263 = arith.constant 0 : index
    %552 = vector.load %arg8[%c0_262, %c0_263] : memref<2x32xf32, #tpu.memory_space<vmem>>, vector<2x32xf32>
    tpu.vector_store %arg8[%c0_262, %c0_263], %546 {strides = array<i32>} : memref<2x32xf32, #tpu.memory_space<vmem>>, vector<2x32xf32>,
    %553 = arith.index_cast %c6_i32 : i32 to index
    %c0_264 = arith.constant 0 : index
    %c0_265 = arith.constant 0 : index
    %554 = vector.load %arg9[%553, %c0_264, %c0_265] : memref<8x2x32xf32, #tpu.memory_space<vmem>>, vector<1x2x32xf32>
    %555 = vector.shape_cast %554 : vector<1x2x32xf32> to vector<2x32xf32>
    %556 = vector.shape_cast %522 : vector<2x32xf32> to vector<1x2x32xf32>
    tpu.vector_store %arg9[%553, %c0_264, %c0_265], %556 {strides = array<i32>} : memref<8x2x32xf32, #tpu.memory_space<vmem>>, vector<1x2x32xf32>,
    %557 = arith.index_cast %482 : i32 to index
    %c0_266 = arith.constant 0 : index
    %c0_267 = arith.constant 0 : index
    %558 = vector.load %arg10[%557, %c0_266, %c0_267] : memref<8x2x32xf32, #tpu.memory_space<vmem>>, vector<1x2x32xf32>
    %559 = vector.shape_cast %558 : vector<1x2x32xf32> to vector<2x32xf32>
    %560 = vector.shape_cast %548 : vector<2x32xf32> to vector<1x2x32xf32>
    tpu.vector_store %arg10[%557, %c0_266, %c0_267], %560 {strides = array<i32>} : memref<8x2x32xf32, #tpu.memory_space<vmem>>, vector<1x2x32xf32>,
    %c7_i32_268 = arith.constant 7 : i32
    %c7_i32_269 = arith.constant 7 : i32
    %561 = arith.subi %c7_i32_269, %c7_i32_268 : i32
    %562 = arith.index_cast %c7_i32_268 : i32 to index
    %c0_270 = arith.constant 0 : index
    %c0_271 = arith.constant 0 : index
    %563 = vector.load %arg0[%562, %c0_270, %c0_271] : memref<8x2x128xf32, #tpu.memory_space<vmem>>, vector<1x2x128xf32>
    %564 = vector.shape_cast %563 : vector<1x2x128xf32> to vector<2x128xf32>
    %c0_272 = arith.constant 0 : index
    %c0_273 = arith.constant 0 : index
    %565 = vector.load %arg5[%c0_272, %c0_273] : memref<2x32xf32, #tpu.memory_space<vmem>>, vector<2x32xf32>
    %c0_274 = arith.constant 0 : index
    %c0_275 = arith.constant 0 : index
    %566 = vector.load %arg2[%c0_274, %c0_275] : memref<32x128xf32, #tpu.memory_space<vmem>>, vector<32x128xf32>
    %cst_276 = arith.constant dense<0.000000e+00> : vector<2x128xf32>
    %567 = tpu.matmul %565, %566, %cst_276 {dimension_numbers = #tpu.dot_dimension_numbers<[1], [0], [0], [1], [0, 0, 1, 1], [], []>} : vector<2x32xf32>, vector<32x128xf32>, vector<2x128xf32> -> vector<2x128xf32>
    %568 = arith.addf %564, %567 : vector<2x128xf32>
    %569 = arith.index_cast %561 : i32 to index
    %c0_277 = arith.constant 0 : index
    %c0_278 = arith.constant 0 : index
    %570 = vector.load %arg1[%569, %c0_277, %c0_278] : memref<8x2x128xf32, #tpu.memory_space<vmem>>, vector<1x2x128xf32>
    %571 = vector.shape_cast %570 : vector<1x2x128xf32> to vector<2x128xf32>
    %c0_279 = arith.constant 0 : index
    %c0_280 = arith.constant 0 : index
    %572 = vector.load %arg7[%c0_279, %c0_280] : memref<2x32xf32, #tpu.memory_space<vmem>>, vector<2x32xf32>
    %c0_281 = arith.constant 0 : index
    %c0_282 = arith.constant 0 : index
    %573 = vector.load %arg3[%c0_281, %c0_282] : memref<32x128xf32, #tpu.memory_space<vmem>>, vector<32x128xf32>
    %cst_283 = arith.constant dense<0.000000e+00> : vector<2x128xf32>
    %574 = tpu.matmul %572, %573, %cst_283 {dimension_numbers = #tpu.dot_dimension_numbers<[1], [0], [0], [1], [0, 0, 1, 1], [], []>} : vector<2x32xf32>, vector<32x128xf32>, vector<2x128xf32> -> vector<2x128xf32>
    %575 = arith.addf %571, %574 : vector<2x128xf32>
    %c0_284 = arith.constant 0 : index
    %c0_285 = arith.constant 0 : index
    %576 = vector.load %arg6[%c0_284, %c0_285] : memref<2x32xf32, #tpu.memory_space<vmem>>, vector<2x32xf32>
    %577 = vector.extract_strided_slice %568 {offsets = [0, 0], sizes = [2, 32], strides = [1, 1]} : vector<2x128xf32> to vector<2x32xf32>
    %578 = arith.negf %577 : vector<2x32xf32>
    %579 = math.exp %578 : vector<2x32xf32>
    %cst_286 = arith.constant 1.000000e+00 : f32
    %580 = vector.broadcast %cst_286 : f32 to vector<2x32xf32>
    %581 = arith.addf %580, %579 : vector<2x32xf32>
    %582 = arith.divf %580, %581 : vector<2x32xf32>
    %583 = vector.extract_strided_slice %568 {offsets = [0, 32], sizes = [2, 32], strides = [1, 1]} : vector<2x128xf32> to vector<2x32xf32>
    %584 = arith.negf %583 : vector<2x32xf32>
    %585 = math.exp %584 : vector<2x32xf32>
    %cst_287 = arith.constant 1.000000e+00 : f32
    %586 = vector.broadcast %cst_287 : f32 to vector<2x32xf32>
    %587 = arith.addf %586, %585 : vector<2x32xf32>
    %588 = arith.divf %586, %587 : vector<2x32xf32>
    %589 = vector.extract_strided_slice %568 {offsets = [0, 64], sizes = [2, 32], strides = [1, 1]} : vector<2x128xf32> to vector<2x32xf32>
    %590 = math.tanh %589 : vector<2x32xf32>
    %591 = vector.extract_strided_slice %568 {offsets = [0, 96], sizes = [2, 32], strides = [1, 1]} : vector<2x128xf32> to vector<2x32xf32>
    %592 = arith.negf %591 : vector<2x32xf32>
    %593 = math.exp %592 : vector<2x32xf32>
    %cst_288 = arith.constant 1.000000e+00 : f32
    %594 = vector.broadcast %cst_288 : f32 to vector<2x32xf32>
    %595 = arith.addf %594, %593 : vector<2x32xf32>
    %596 = arith.divf %594, %595 : vector<2x32xf32>
    %597 = arith.mulf %588, %576 : vector<2x32xf32>
    %598 = arith.mulf %582, %590 : vector<2x32xf32>
    %599 = arith.addf %597, %598 : vector<2x32xf32>
    %600 = math.tanh %599 : vector<2x32xf32>
    %601 = arith.mulf %596, %600 : vector<2x32xf32>
    %c0_289 = arith.constant 0 : index
    %c0_290 = arith.constant 0 : index
    %602 = vector.load %arg8[%c0_289, %c0_290] : memref<2x32xf32, #tpu.memory_space<vmem>>, vector<2x32xf32>
    %603 = vector.extract_strided_slice %575 {offsets = [0, 0], sizes = [2, 32], strides = [1, 1]} : vector<2x128xf32> to vector<2x32xf32>
    %604 = arith.negf %603 : vector<2x32xf32>
    %605 = math.exp %604 : vector<2x32xf32>
    %cst_291 = arith.constant 1.000000e+00 : f32
    %606 = vector.broadcast %cst_291 : f32 to vector<2x32xf32>
    %607 = arith.addf %606, %605 : vector<2x32xf32>
    %608 = arith.divf %606, %607 : vector<2x32xf32>
    %609 = vector.extract_strided_slice %575 {offsets = [0, 32], sizes = [2, 32], strides = [1, 1]} : vector<2x128xf32> to vector<2x32xf32>
    %610 = arith.negf %609 : vector<2x32xf32>
    %611 = math.exp %610 : vector<2x32xf32>
    %cst_292 = arith.constant 1.000000e+00 : f32
    %612 = vector.broadcast %cst_292 : f32 to vector<2x32xf32>
    %613 = arith.addf %612, %611 : vector<2x32xf32>
    %614 = arith.divf %612, %613 : vector<2x32xf32>
    %615 = vector.extract_strided_slice %575 {offsets = [0, 64], sizes = [2, 32], strides = [1, 1]} : vector<2x128xf32> to vector<2x32xf32>
    %616 = math.tanh %615 : vector<2x32xf32>
    %617 = vector.extract_strided_slice %575 {offsets = [0, 96], sizes = [2, 32], strides = [1, 1]} : vector<2x128xf32> to vector<2x32xf32>
    %618 = arith.negf %617 : vector<2x32xf32>
    %619 = math.exp %618 : vector<2x32xf32>
    %cst_293 = arith.constant 1.000000e+00 : f32
    %620 = vector.broadcast %cst_293 : f32 to vector<2x32xf32>
    %621 = arith.addf %620, %619 : vector<2x32xf32>
    %622 = arith.divf %620, %621 : vector<2x32xf32>
    %623 = arith.mulf %614, %602 : vector<2x32xf32>
    %624 = arith.mulf %608, %616 : vector<2x32xf32>
    %625 = arith.addf %623, %624 : vector<2x32xf32>
    %626 = math.tanh %625 : vector<2x32xf32>
    %627 = arith.mulf %622, %626 : vector<2x32xf32>
    %c0_294 = arith.constant 0 : index
    %c0_295 = arith.constant 0 : index
    %628 = vector.load %arg5[%c0_294, %c0_295] : memref<2x32xf32, #tpu.memory_space<vmem>>, vector<2x32xf32>
    tpu.vector_store %arg5[%c0_294, %c0_295], %601 {strides = array<i32>} : memref<2x32xf32, #tpu.memory_space<vmem>>, vector<2x32xf32>,
    %c0_296 = arith.constant 0 : index
    %c0_297 = arith.constant 0 : index
    %629 = vector.load %arg6[%c0_296, %c0_297] : memref<2x32xf32, #tpu.memory_space<vmem>>, vector<2x32xf32>
    tpu.vector_store %arg6[%c0_296, %c0_297], %599 {strides = array<i32>} : memref<2x32xf32, #tpu.memory_space<vmem>>, vector<2x32xf32>,
    %c0_298 = arith.constant 0 : index
    %c0_299 = arith.constant 0 : index
    %630 = vector.load %arg7[%c0_298, %c0_299] : memref<2x32xf32, #tpu.memory_space<vmem>>, vector<2x32xf32>
    tpu.vector_store %arg7[%c0_298, %c0_299], %627 {strides = array<i32>} : memref<2x32xf32, #tpu.memory_space<vmem>>, vector<2x32xf32>,
    %c0_300 = arith.constant 0 : index
    %c0_301 = arith.constant 0 : index
    %631 = vector.load %arg8[%c0_300, %c0_301] : memref<2x32xf32, #tpu.memory_space<vmem>>, vector<2x32xf32>
    tpu.vector_store %arg8[%c0_300, %c0_301], %625 {strides = array<i32>} : memref<2x32xf32, #tpu.memory_space<vmem>>, vector<2x32xf32>,
    %632 = arith.index_cast %c7_i32_268 : i32 to index
    %c0_302 = arith.constant 0 : index
    %c0_303 = arith.constant 0 : index
    %633 = vector.load %arg9[%632, %c0_302, %c0_303] : memref<8x2x32xf32, #tpu.memory_space<vmem>>, vector<1x2x32xf32>
    %634 = vector.shape_cast %633 : vector<1x2x32xf32> to vector<2x32xf32>
    %635 = vector.shape_cast %601 : vector<2x32xf32> to vector<1x2x32xf32>
    tpu.vector_store %arg9[%632, %c0_302, %c0_303], %635 {strides = array<i32>} : memref<8x2x32xf32, #tpu.memory_space<vmem>>, vector<1x2x32xf32>,
    %636 = arith.index_cast %561 : i32 to index
    %c0_304 = arith.constant 0 : index
    %c0_305 = arith.constant 0 : index
    %637 = vector.load %arg10[%636, %c0_304, %c0_305] : memref<8x2x32xf32, #tpu.memory_space<vmem>>, vector<1x2x32xf32>
    %638 = vector.shape_cast %637 : vector<1x2x32xf32> to vector<2x32xf32>
    %639 = vector.shape_cast %627 : vector<2x32xf32> to vector<1x2x32xf32>
    tpu.vector_store %arg10[%636, %c0_304, %c0_305], %639 {strides = array<i32>} : memref<8x2x32xf32, #tpu.memory_space<vmem>>, vector<1x2x32xf32>,
    %c8_i32 = arith.constant 8 : i32
    %c0_306 = arith.constant 0 : index
    %c0_307 = arith.constant 0 : index
    %c0_308 = arith.constant 0 : index
    %640 = vector.load %arg9[%c0_306, %c0_307, %c0_308] : memref<8x2x32xf32, #tpu.memory_space<vmem>>, vector<8x2x32xf32>
    %c0_309 = arith.constant 0 : index
    %c0_310 = arith.constant 0 : index
    %c0_311 = arith.constant 0 : index
    %641 = vector.load %arg10[%c0_309, %c0_310, %c0_311] : memref<8x2x32xf32, #tpu.memory_space<vmem>>, vector<8x2x32xf32>
    %642 = tpu.concatenate %640, %641 in 2 : vector<8x2x32xf32>, vector<8x2x32xf32> -> vector<8x2x64xf32>
    %c0_312 = arith.constant 0 : index
    %c0_313 = arith.constant 0 : index
    %c0_314 = arith.constant 0 : index
    %643 = vector.load %arg4[%c0_312, %c0_313, %c0_314] : memref<8x2x64xf32, #tpu.memory_space<vmem>>, vector<8x2x64xf32>
    tpu.vector_store %arg4[%c0_312, %c0_313, %c0_314], %642 {strides = array<i32>} : memref<8x2x64xf32, #tpu.memory_space<vmem>>, vector<8x2x64xf32>,
    return
  }
}

</mosaic_0001>

<bundles_post_ra>
// kernel: bidirectional_lstm.2
= control target key start
LH: loop header
LB: loop body
LE: loop exit
PB: predicated region body
PF: predicated region fallthrough
CT: control target
= control target key end

     0   :  { %vm17_vm0 = vcmask 254976   ;;  %v2572_v0 = vmov 0.0|0.0   ;;  %v2573_v4 = vmov 0.0   ;;  %vm2574_vm1 = vmmov 0   ;;  %s2575_s5 = smov 32   ;;  %s2576_s10 = smov 64   ;;  %s3015_s3 = inlined_call_operand.vmem [shape: f32[32,128], index: 3, kind: input, shape index: {}]   ;;  %s3016_s2 = inlined_call_operand.vmem [shape: f32[32,128], index: 2, kind: input, shape index: {}]   ;;  %s3017_s1 = inlined_call_operand.vmem [shape: f32[8,2,128], index: 1, kind: input, shape index: {}]   ;;  %s3018_s0 = inlined_call_operand.vmem [shape: f32[8,2,128], index: 0, kind: input, shape index: {}]   ;;  %s3019_s4 = inlined_call_operand.vmem [shape: f32[8,2,64], index: 4, kind: output, shape index: {}]  }
   0x1   :  { %2348 = vmatprep.subr.bf16.mxu1 %v2572_v0  ;;  %v106_v1 = vld [vmem:[%s3015_s3] sm:$0xff]  ;;  %v107_v2 = vld [vmem:[%s3015_s3 + $0x8] sm:$0xff]  ;;  %2342 = vmatprep.subr.bf16.mxu0 %v2572_v0  ;;  %20 = vst.msk [vmem:[#allocation4] sm:$0x3] %vm17_vm0, %v2573_v4  ;;  %18 = vst.msk [vmem:[#allocation2] sm:$0x3] %vm17_vm0, %v2573_v4 }
   0x2   :  { %v24_v3 = vld [vmem:[%s3016_s2] sm:$0xff]  ;;  %19 = vst.msk [vmem:[#allocation3] sm:$0x3] %vm17_vm0, %v2573_v4  ;;  %21 = vst.msk [vmem:[#allocation5] sm:$0x3] %vm17_vm0, %v2573_v4  ;;  %v2622_v5 = vpack.c.bf16 %v107_v2, %v106_v1  ;;  %v25_v6 = vld [vmem:[%s3016_s2 + $0x8] sm:$0xff]  ;;  %2185 = vmatprep.mubr.msk.f32.mxu1 %vm2574_vm1, %v2573_v4  ;;  %2174 = vmatprep.mubr.msk.f32.mxu0 %vm2574_vm1, %v2573_v4 }
   0x3   :  { %v108_v7 = vld [vmem:[%s3015_s3 + $0x10] sm:$0xff]  ;;  %v109_v8 = vld [vmem:[%s3015_s3 + $0x18] sm:$0xff]  ;;  %v2637_v9 = vpack.c.bf16 %v25_v6, %v24_v3  ;;  %vm28_vm2 = vcmask 261120   ;;  %v2041_v17 = vld [vmem:[%s3017_s1 + $0xe] sm:$0x3]  ;;  %s2577_s11 = smov 96  }
   0x4   :  { %v26_v10 = vld [vmem:[%s3016_s2 + $0x10] sm:$0xff]  ;;  %v27_v11 = vld [vmem:[%s3016_s2 + $0x18] sm:$0xff]  ;;  %2350 = vmatpush3.bf16.msra.mxu1 %v2622_v5  ;;  %v2646_v12 = vpack.c.bf16 %v109_v8, %v108_v7  ;;  %v22_v18 = vld [vmem:[%s3018_s0] sm:$0x3]  ;;  %vm2027_vm3 = vcmask 517120  }
   0x5   :  { %2351 = vmatprep.subr.bf16.mxu1 %v2572_v0  ;;  %2344 = vmatpush3.bf16.msra.mxu0 %v2637_v9  ;;  %v2650_v13 = vpack.c.bf16 %v27_v11, %v26_v10  ;;  %v2047_v62 = vld [vmem:[%s3017_s1 + $0xc] sm:$0x3]  ;;  %v2045_v3 = vld [vmem:[%s3018_s0 + $0x2] sm:$0x3] }
   0x6   :  { %2345 = vmatprep.subr.bf16.mxu0 %v2572_v0 }
   0x8   :  { %2353 = vmatpush3.bf16.msra.mxu1 %v2646_v12  ;;  %v105_v14 = vld [vmem:[#allocation4] sm:$0x3]  ;;  %v23_v16 = vld [vmem:[#allocation2] sm:$0x3] }
   0x9   :  { %v213_v15 = vld [vmem:[#allocation5] sm:$0x3]  ;;  %2347 = vmatpush3.bf16.msra.mxu0 %v2650_v13  ;;  %2360 = vmatprep.subr.bf16.mxu1 %v2572_v0  ;;  %v184_v27 = vld [vmem:[#allocation3] sm:$0x3] }
   0xa   :  { %222 = vrot.lane.b32.xlu1 %v213_v15, %s2575_s5  ;;  %2354 = vmatprep.subr.bf16.mxu0 %v2572_v0 }
   0xb   :  { %2186 = vmatmul.mubr.msk.f32.vlgmr.msra.gmra.mrb[0].mxu1 %vm28_vm2, %v105_v14 }
   0xc   :  { %2175 = vmatmul.mubr.msk.f32.vlgmr.msra.gmra.mrb[0].mxu0 %vm28_vm2, %v23_v16  ;;  %2362 = vmatpush3.bf16.msra.mxu1 %v2622_v5 }
   0xd   :  { %2363 = vmatprep.subr.bf16.mxu1 %v2572_v0  ;;  %2356 = vmatpush3.bf16.msra.mxu0 %v2637_v9 }
   0xe   :  { %2207 = vmatprep.mubr.msk.f32.mxu1 %vm2574_vm1, %v2573_v4  ;;  %2357 = vmatprep.subr.bf16.mxu0 %v2572_v0 }
   0xf   :  { %2196 = vmatprep.mubr.msk.f32.mxu0 %vm2574_vm1, %v2573_v4 }
  0x10   :  { %2365 = vmatpush3.bf16.msra.mxu1 %v2646_v12 }
  0x11   :  { %2359 = vmatpush3.bf16.msra.mxu0 %v2650_v13  ;;  %2372 = vmatprep.subr.bf16.mxu1 %v2572_v0 }
  0x12   :  { %2366 = vmatprep.subr.bf16.mxu0 %v2572_v0 }
  0x7c   :  { %v223_v40 = vpop.permute.xlu1 %222 }
  0xde   :  { %v179_v19 = vpop.f32.mrb[0].mxu1 }
  0xdf   :  { %v183_v20 = vadd.f32 %v2041_v17, %v179_v19  ;;  %v2187_v21 = vpop.f32.mrb[1].mxu1  ;;  %v98_v22 = vpop.f32.mrb[0].mxu0 }
  0xe0   :  { %v102_v23 = vadd.f32 %v98_v22, %v22_v18  ;;  %v2176_v24 = vpop.f32.mrb[1].mxu0 }
  0xe1   :  { %2444 = vtanh.f32 %v183_v20  ;;  %v2044_v28 = vmul.f32 -1.442695, %v183_v20 }
  0xe2   :  { %2446 = vtanh.f32 %v102_v23  ;;  %v2043_v29 = vmul.f32 -1.442695, %v102_v23 }
  0xe3   :  { %2448 = vpow2.f32 %v2044_v28 }
  0xe4   :  { %2450 = vpow2.f32 %v2043_v29 }
  0xeb   :  { %v2445_v25 = vpop.eup %2444 }
  0xec   :  { %227 = vrot.lane.b32.xlu0 %v2445_v25, %s2576_s10  ;;  %v2447_v26 = vpop.eup %2446 }
  0xed   :  { %v2449_v30 = vpop.eup %2448 }
  0xee   :  { %v2451_v31 = vpop.eup %2450  ;;  %v217_v32 = vadd.f32 1.0, %v2449_v30 }
  0xef   :  { %v188_v33 = vadd.f32 1.0, %v2451_v31 }
  0xf0   :  { %198 = vrot.lane.b32.xlu0 %v2447_v26, %s2576_s10  ;;  %2452 = vrcp.f32 %v217_v32 }
  0xf1   :  { %2454 = vrcp.f32 %v188_v33 }
  0xf4   :  { %193 = vrot.lane.b32.xlu0 %v184_v27, %s2575_s5 }
  0xfa   :  { %v2453_v34 = vpop.eup %2452 }
  0xfb   :  { %v2455_v37 = vpop.eup %2454  ;;  %v225_v41 = vmul.f32 %v2453_v34, %v223_v40 }
 0x15e   :  { %v228_v35 = vpop.permute.xlu0 %227 }
 0x15f   :  { %v230_v36 = vmul.f32 %v2453_v34, %v228_v35 }
 0x161   :  { %232 = vrot.lane.b32.xlu1 %v230_v36, %s2575_s5 }
 0x162   :  { %v199_v38 = vpop.permute.xlu0 %198 }
 0x163   :  { %v201_v39 = vmul.f32 %v2455_v37, %v199_v38 }
 0x165   :  { %203 = vrot.lane.b32.xlu1 %v201_v39, %s2575_s5 }
 0x166   :  { %v194_v42 = vpop.permute.xlu0 %193 }
 0x167   :  { %v196_v45 = vmul.f32 %v2455_v37, %v194_v42 }
 0x1d3   :  { %v233_v43 = vpop.permute.xlu1 %232 }
 0x1d4   :  { %v235_v44 = vadd.f32 %v233_v43, %v225_v41 }
 0x1d6   :  { %2456 = vtanh.f32 %v235_v44 }
 0x1d7   :  { %v204_v46 = vpop.permute.xlu1 %203 }
 0x1d8   :  { %v206_v47 = vadd.f32 %v204_v46, %v196_v45 }
 0x1da   :  { %2458 = vtanh.f32 %v206_v47 }
 0x1e0   :  { %v2457_v48 = vpop.eup %2456 }
 0x1e1   :  { %238 = vrot.lane.b32.xlu0 %v2457_v48, %s2576_s10  ;;  %v2053_v48 = vld [vmem:[%s3017_s1 + $0xa] sm:$0x3] }
 0x1e4   :  { %v2459_v49 = vpop.eup %2458 }
 0x1e5   :  { %209 = vrot.lane.b32.xlu1 %v2459_v49, %s2576_s10 }
 0x253   :  { %v239_v50 = vpop.permute.xlu0 %238 }
 0x254   :  { %v241_v51 = vmul.f32 %v2453_v34, %v239_v50 }
 0x256   :  { %253 = vrot.lane.b32.xlu0 %v241_v51, %s2575_s5 }
 0x257   :  { %v210_v52 = vpop.permute.xlu1 %209 }
 0x258   :  { %v212_v53 = vmul.f32 %v2455_v37, %v210_v52  ;;  %v2051_v52 = vld [vmem:[%s3018_s0 + $0x4] sm:$0x3] }
 0x25a   :  { %258 = vrot.lane.b32.xlu0 %v235_v44, %s2577_s11  ;;  %243 = vrot.lane.b32.xlu1 %v212_v53, %s2575_s5 }
 0x25e   :  { %248 = vrot.lane.b32.xlu0 %v206_v47, %s2577_s11 }
 0x2c8   :  { %v254_v54 = vpop.permute.xlu0 %253 }
 0x2c9   :  { %256 = vst.msk [vmem:[#allocation4] sm:$0x3] %vm17_vm0, %v254_v54  ;;  %264 = vst.msk [vmem:[#allocation7 + $0xe] sm:$0x3] %vm17_vm0, %v254_v54 }
 0x2cc   :  { %v259_v55 = vpop.permute.xlu0 %258  ;;  %v244_v56 = vpop.permute.xlu1 %243 }
 0x2cd   :  { %261 = vst.msk [vmem:[#allocation5] sm:$0x3] %vm17_vm0, %v259_v55  ;;  %246 = vst.msk [vmem:[#allocation2] sm:$0x3] %vm17_vm0, %v244_v56 }
 0x2ce   :  { %262 = vst.msk [vmem:[#allocation6] sm:$0x3] %vm17_vm0, %v244_v56 }
 0x2d0   :  { %v249_v57 = vpop.permute.xlu0 %248  ;;  %v348_v58 = vld [vmem:[#allocation4] sm:$0x3] }
 0x2d1   :  { %251 = vst.msk [vmem:[#allocation3] sm:$0x3] %vm17_vm0, %v249_v57  ;;  %2208 = vmatmul.mubr.msk.f32.vlgmr.msra.gmra.mrb[2].mxu1 %vm28_vm2, %v348_v58 }
 0x2d2   :  { %2374 = vmatpush3.bf16.msra.mxu1 %v2622_v5  ;;  %2229 = vmatprep.mubr.msk.f32.mxu1 %vm2574_vm1, %v2573_v4 }
 0x2d3   :  { %2375 = vmatprep.subr.bf16.mxu1 %v2572_v0 }
 0x2d4   :  { %v456_v59 = vld [vmem:[#allocation5] sm:$0x3]  ;;  %v267_v60 = vld [vmem:[#allocation2] sm:$0x3] }
 0x2d5   :  { %465 = vrot.lane.b32.xlu0 %v456_v59, %s2575_s5  ;;  %2197 = vmatmul.mubr.msk.f32.vlgmr.msra.gmra.mrb[2].mxu0 %vm28_vm2, %v267_v60 }
 0x2d6   :  { %2368 = vmatpush3.bf16.msra.mxu0 %v2637_v9  ;;  %2377 = vmatpush3.bf16.msra.mxu1 %v2646_v12 }
 0x2d7   :  { %2369 = vmatprep.subr.bf16.mxu0 %v2572_v0  ;;  %2218 = vmatprep.mubr.msk.f32.mxu0 %vm2574_vm1, %v2573_v4 }
 0x2d8   :  { %v427_v61 = vld [vmem:[#allocation3] sm:$0x3]  ;;  %2384 = vmatprep.subr.bf16.mxu1 %v2572_v0 }
 0x2d9   :  { %436 = vrot.lane.b32.xlu0 %v427_v61, %s2575_s5 }
 0x2da   :  { %2371 = vmatpush3.bf16.msra.mxu0 %v2650_v13 }
 0x2db   :  { %2378 = vmatprep.subr.bf16.mxu0 %v2572_v0 }
 0x347   :  { %v466_v26 = vpop.permute.xlu0 %465 }
 0x34b   :  { %v437_v30 = vpop.permute.xlu0 %436 }
 0x3a4   :  { %v422_v63 = vpop.f32.mrb[2].mxu1 }
 0x3a5   :  { %v426_v1 = vadd.f32 %v2047_v62, %v422_v63  ;;  %v2209_v2 = vpop.f32.mrb[3].mxu1 }
 0x3a7   :  { %2460 = vtanh.f32 %v426_v1  ;;  %v2050_v14 = vmul.f32 -1.442695, %v426_v1 }
 0x3a8   :  { %v341_v6 = vpop.f32.mrb[2].mxu0 }
 0x3a9   :  { %v345_v7 = vadd.f32 %v2045_v3, %v341_v6  ;;  %v2198_v8 = vpop.f32.mrb[3].mxu0 }
 0x3ab   :  { %2462 = vtanh.f32 %v345_v7  ;;  %v2049_v15 = vmul.f32 -1.442695, %v345_v7 }
 0x3ac   :  { %2464 = vpow2.f32 %v2050_v14 }
 0x3ad   :  { %2466 = vpow2.f32 %v2049_v15 }
 0x3b1   :  { %v2461_v10 = vpop.eup %2460 }
 0x3b2   :  { %470 = vrot.lane.b32.xlu1 %v2461_v10, %s2576_s10 }
 0x3b5   :  { %v2463_v11 = vpop.eup %2462 }
 0x3b6   :  { %441 = vrot.lane.b32.xlu1 %v2463_v11, %s2576_s10  ;;  %v2465_v16 = vpop.eup %2464 }
 0x3b7   :  { %v460_v17 = vadd.f32 1.0, %v2465_v16  ;;  %v2467_v18 = vpop.eup %2466 }
 0x3b8   :  { %v431_v19 = vadd.f32 1.0, %v2467_v18 }
 0x3b9   :  { %2468 = vrcp.f32 %v460_v17 }
 0x3ba   :  { %2470 = vrcp.f32 %v431_v19 }
 0x3c3   :  { %v2469_v20 = vpop.eup %2468 }
 0x3c4   :  { %v2471_v23 = vpop.eup %2470  ;;  %v468_v27 = vmul.f32 %v2469_v20, %v466_v26 }
 0x3c5   :  { %v439_v31 = vmul.f32 %v2471_v23, %v437_v30 }
 0x424   :  { %v471_v21 = vpop.permute.xlu1 %470 }
 0x425   :  { %v473_v22 = vmul.f32 %v2469_v20, %v471_v21 }
 0x427   :  { %475 = vrot.lane.b32.xlu1 %v473_v22, %s2575_s5 }
 0x428   :  { %v442_v24 = vpop.permute.xlu1 %441 }
 0x429   :  { %v444_v25 = vmul.f32 %v2471_v23, %v442_v24 }
 0x42b   :  { %446 = vrot.lane.b32.xlu1 %v444_v25, %s2575_s5 }
 0x499   :  { %v476_v28 = vpop.permute.xlu1 %475 }
 0x49a   :  { %v478_v29 = vadd.f32 %v476_v28, %v468_v27 }
 0x49c   :  { %2472 = vtanh.f32 %v478_v29 }
 0x49d   :  { %v447_v32 = vpop.permute.xlu1 %446 }
 0x49e   :  { %v449_v33 = vadd.f32 %v447_v32, %v439_v31 }
 0x4a0   :  { %2474 = vtanh.f32 %v449_v33 }
 0x4a6   :  { %v2473_v34 = vpop.eup %2472 }
 0x4a7   :  { %481 = vrot.lane.b32.xlu0 %v2473_v34, %s2576_s10  ;;  %v2059_v34 = vld [vmem:[%s3017_s1 + $0x8] sm:$0x3] }
 0x4aa   :  { %v2475_v35 = vpop.eup %2474 }
 0x4ab   :  { %452 = vrot.lane.b32.xlu1 %v2475_v35, %s2576_s10 }
 0x519   :  { %v482_v36 = vpop.permute.xlu0 %481 }
 0x51a   :  { %v484_v37 = vmul.f32 %v2469_v20, %v482_v36 }
 0x51c   :  { %496 = vrot.lane.b32.xlu0 %v484_v37, %s2575_s5 }
 0x51d   :  { %v453_v38 = vpop.permute.xlu1 %452 }
 0x51e   :  { %v455_v39 = vmul.f32 %v2471_v23, %v453_v38  ;;  %v2057_v38 = vld [vmem:[%s3018_s0 + $0x6] sm:$0x3] }
 0x520   :  { %501 = vrot.lane.b32.xlu0 %v478_v29, %s2577_s11  ;;  %486 = vrot.lane.b32.xlu1 %v455_v39, %s2575_s5 }
 0x524   :  { %491 = vrot.lane.b32.xlu0 %v449_v33, %s2577_s11 }
 0x58e   :  { %v497_v40 = vpop.permute.xlu0 %496 }
 0x58f   :  { %499 = vst.msk [vmem:[#allocation4] sm:$0x3] %vm17_vm0, %v497_v40  ;;  %508 = vst.msk [vmem:[#allocation7 + $0xc] sm:$0x3] %vm17_vm0, %v497_v40 }
 0x592   :  { %v502_v41 = vpop.permute.xlu0 %501  ;;  %v487_v42 = vpop.permute.xlu1 %486 }
 0x593   :  { %504 = vst.msk [vmem:[#allocation5] sm:$0x3] %vm17_vm0, %v502_v41  ;;  %489 = vst.msk [vmem:[#allocation2] sm:$0x3] %vm17_vm0, %v487_v42 }
 0x594   :  { %506 = vst.msk [vmem:[#allocation6 + $0x2] sm:$0x3] %vm17_vm0, %v487_v42 }
 0x596   :  { %v492_v43 = vpop.permute.xlu0 %491  ;;  %v592_v44 = vld [vmem:[#allocation4] sm:$0x3] }
 0x597   :  { %494 = vst.msk [vmem:[#allocation3] sm:$0x3] %vm17_vm0, %v492_v43  ;;  %2230 = vmatmul.mubr.msk.f32.vlgmr.msra.gmra.mrb[4].mxu1 %vm28_vm2, %v592_v44 }
 0x598   :  { %2386 = vmatpush3.bf16.msra.mxu1 %v2622_v5  ;;  %2251 = vmatprep.mubr.msk.f32.mxu1 %vm2574_vm1, %v2573_v4 }
 0x599   :  { %2387 = vmatprep.subr.bf16.mxu1 %v2572_v0 }
 0x59a   :  { %v700_v45 = vld [vmem:[#allocation5] sm:$0x3]  ;;  %v511_v46 = vld [vmem:[#allocation2] sm:$0x3] }
 0x59b   :  { %709 = vrot.lane.b32.xlu0 %v700_v45, %s2575_s5  ;;  %2219 = vmatmul.mubr.msk.f32.vlgmr.msra.gmra.mrb[4].mxu0 %vm28_vm2, %v511_v46 }
 0x59c   :  { %2380 = vmatpush3.bf16.msra.mxu0 %v2637_v9  ;;  %2389 = vmatpush3.bf16.msra.mxu1 %v2646_v12 }
 0x59d   :  { %2381 = vmatprep.subr.bf16.mxu0 %v2572_v0  ;;  %2240 = vmatprep.mubr.msk.f32.mxu0 %vm2574_vm1, %v2573_v4 }
 0x59e   :  { %v671_v47 = vld [vmem:[#allocation3] sm:$0x3]  ;;  %2396 = vmatprep.subr.bf16.mxu1 %v2572_v0 }
 0x59f   :  { %680 = vrot.lane.b32.xlu0 %v671_v47, %s2575_s5 }
 0x5a0   :  { %2383 = vmatpush3.bf16.msra.mxu0 %v2650_v13 }
 0x5a1   :  { %2390 = vmatprep.subr.bf16.mxu0 %v2572_v0 }
 0x60d   :  { %v710_v10 = vpop.permute.xlu0 %709 }
 0x611   :  { %v681_v16 = vpop.permute.xlu0 %680 }
 0x66a   :  { %v666_v49 = vpop.f32.mrb[4].mxu1 }
 0x66b   :  { %v670_v50 = vadd.f32 %v2053_v48, %v666_v49  ;;  %v2231_v51 = vpop.f32.mrb[5].mxu1 }
 0x66d   :  { %2476 = vtanh.f32 %v670_v50  ;;  %v2056_v58 = vmul.f32 -1.442695, %v670_v50 }
 0x66e   :  { %v585_v53 = vpop.f32.mrb[4].mxu0 }
 0x66f   :  { %v589_v54 = vadd.f32 %v2051_v52, %v585_v53  ;;  %v2220_v55 = vpop.f32.mrb[5].mxu0 }
 0x671   :  { %2478 = vtanh.f32 %v589_v54  ;;  %v2055_v59 = vmul.f32 -1.442695, %v589_v54 }
 0x672   :  { %2480 = vpow2.f32 %v2056_v58 }
 0x673   :  { %2482 = vpow2.f32 %v2055_v59 }
 0x677   :  { %v2477_v56 = vpop.eup %2476 }
 0x678   :  { %714 = vrot.lane.b32.xlu1 %v2477_v56, %s2576_s10 }
 0x67b   :  { %v2479_v57 = vpop.eup %2478 }
 0x67c   :  { %685 = vrot.lane.b32.xlu1 %v2479_v57, %s2576_s10  ;;  %v2481_v60 = vpop.eup %2480 }
 0x67d   :  { %v704_v61 = vadd.f32 1.0, %v2481_v60  ;;  %v2483_v62 = vpop.eup %2482 }
 0x67e   :  { %v675_v63 = vadd.f32 1.0, %v2483_v62 }
 0x67f   :  { %2484 = vrcp.f32 %v704_v61 }
 0x680   :  { %2486 = vrcp.f32 %v675_v63 }
 0x689   :  { %v2485_v1 = vpop.eup %2484 }
 0x68a   :  { %v2487_v6 = vpop.eup %2486  ;;  %v712_v11 = vmul.f32 %v2485_v1, %v710_v10 }
 0x68b   :  { %v683_v17 = vmul.f32 %v2487_v6, %v681_v16 }
 0x6ea   :  { %v715_v2 = vpop.permute.xlu1 %714 }
 0x6eb   :  { %v717_v3 = vmul.f32 %v2485_v1, %v715_v2 }
 0x6ed   :  { %719 = vrot.lane.b32.xlu1 %v717_v3, %s2575_s5 }
 0x6ee   :  { %v686_v7 = vpop.permute.xlu1 %685 }
 0x6ef   :  { %v688_v8 = vmul.f32 %v2487_v6, %v686_v7 }
 0x6f1   :  { %690 = vrot.lane.b32.xlu1 %v688_v8, %s2575_s5 }
 0x75f   :  { %v720_v14 = vpop.permute.xlu1 %719 }
 0x760   :  { %v722_v15 = vadd.f32 %v720_v14, %v712_v11 }
 0x762   :  { %2488 = vtanh.f32 %v722_v15 }
 0x763   :  { %v691_v18 = vpop.permute.xlu1 %690 }
 0x764   :  { %v693_v19 = vadd.f32 %v691_v18, %v683_v17 }
 0x766   :  { %2490 = vtanh.f32 %v693_v19 }
 0x76c   :  { %v2489_v20 = vpop.eup %2488 }
 0x76d   :  { %725 = vrot.lane.b32.xlu0 %v2489_v20, %s2576_s10 }
 0x770   :  { %v2491_v21 = vpop.eup %2490 }
 0x771   :  { %696 = vrot.lane.b32.xlu1 %v2491_v21, %s2576_s10  ;;  %v2063_v21 = vld [vmem:[%s3018_s0 + $0x8] sm:$0x3] }
 0x7df   :  { %v726_v22 = vpop.permute.xlu0 %725 }
 0x7e0   :  { %v728_v23 = vmul.f32 %v2485_v1, %v726_v22 }
 0x7e2   :  { %740 = vrot.lane.b32.xlu0 %v728_v23, %s2575_s5 }
 0x7e3   :  { %v697_v24 = vpop.permute.xlu1 %696 }
 0x7e4   :  { %v699_v25 = vmul.f32 %v2487_v6, %v697_v24 }
 0x7e6   :  { %745 = vrot.lane.b32.xlu0 %v722_v15, %s2577_s11  ;;  %730 = vrot.lane.b32.xlu1 %v699_v25, %s2575_s5 }
 0x7ea   :  { %735 = vrot.lane.b32.xlu0 %v693_v19, %s2577_s11 }
 0x854   :  { %v741_v26 = vpop.permute.xlu0 %740 }
 0x855   :  { %743 = vst.msk [vmem:[#allocation4] sm:$0x3] %vm17_vm0, %v741_v26  ;;  %752 = vst.msk [vmem:[#allocation7 + $0xa] sm:$0x3] %vm17_vm0, %v741_v26 }
 0x858   :  { %v746_v27 = vpop.permute.xlu0 %745  ;;  %v731_v28 = vpop.permute.xlu1 %730 }
 0x859   :  { %748 = vst.msk [vmem:[#allocation5] sm:$0x3] %vm17_vm0, %v746_v27  ;;  %733 = vst.msk [vmem:[#allocation2] sm:$0x3] %vm17_vm0, %v731_v28 }
 0x85a   :  { %750 = vst.msk [vmem:[#allocation6 + $0x4] sm:$0x3] %vm17_vm0, %v731_v28 }
 0x85c   :  { %v736_v29 = vpop.permute.xlu0 %735  ;;  %v836_v30 = vld [vmem:[#allocation4] sm:$0x3] }
 0x85d   :  { %738 = vst.msk [vmem:[#allocation3] sm:$0x3] %vm17_vm0, %v736_v29  ;;  %2252 = vmatmul.mubr.msk.f32.vlgmr.msra.gmra.mrb[6].mxu1 %vm28_vm2, %v836_v30 }
 0x85e   :  { %2398 = vmatpush3.bf16.msra.mxu1 %v2622_v5  ;;  %2273 = vmatprep.mubr.msk.f32.mxu1 %vm2574_vm1, %v2573_v4 }
 0x85f   :  { %2399 = vmatprep.subr.bf16.mxu1 %v2572_v0 }
 0x860   :  { %v944_v31 = vld [vmem:[#allocation5] sm:$0x3]  ;;  %v755_v32 = vld [vmem:[#allocation2] sm:$0x3] }
 0x861   :  { %953 = vrot.lane.b32.xlu0 %v944_v31, %s2575_s5  ;;  %2241 = vmatmul.mubr.msk.f32.vlgmr.msra.gmra.mrb[6].mxu0 %vm28_vm2, %v755_v32 }
 0x862   :  { %2392 = vmatpush3.bf16.msra.mxu0 %v2637_v9  ;;  %2401 = vmatpush3.bf16.msra.mxu1 %v2646_v12 }
 0x863   :  { %2393 = vmatprep.subr.bf16.mxu0 %v2572_v0  ;;  %2262 = vmatprep.mubr.msk.f32.mxu0 %vm2574_vm1, %v2573_v4 }
 0x864   :  { %v915_v33 = vld [vmem:[#allocation3] sm:$0x3]  ;;  %2408 = vmatprep.subr.bf16.mxu1 %v2572_v0 }
 0x865   :  { %924 = vrot.lane.b32.xlu0 %v915_v33, %s2575_s5 }
 0x866   :  { %2395 = vmatpush3.bf16.msra.mxu0 %v2650_v13 }
 0x867   :  { %2402 = vmatprep.subr.bf16.mxu0 %v2572_v0 }
 0x8d3   :  { %v954_v56 = vpop.permute.xlu0 %953 }
 0x8d7   :  { %v925_v60 = vpop.permute.xlu0 %924 }
 0x930   :  { %v910_v35 = vpop.f32.mrb[6].mxu1 }
 0x931   :  { %v914_v36 = vadd.f32 %v2059_v34, %v910_v35  ;;  %v2253_v37 = vpop.f32.mrb[7].mxu1 }
 0x933   :  { %2492 = vtanh.f32 %v914_v36  ;;  %v2062_v44 = vmul.f32 -1.442695, %v914_v36 }
 0x934   :  { %v829_v39 = vpop.f32.mrb[6].mxu0 }
 0x935   :  { %v833_v40 = vadd.f32 %v2057_v38, %v829_v39  ;;  %v2242_v41 = vpop.f32.mrb[7].mxu0 }
 0x937   :  { %2494 = vtanh.f32 %v833_v40  ;;  %v2061_v45 = vmul.f32 -1.442695, %v833_v40 }
 0x938   :  { %2496 = vpow2.f32 %v2062_v44 }
 0x939   :  { %2498 = vpow2.f32 %v2061_v45 }
 0x93d   :  { %v2493_v42 = vpop.eup %2492 }
 0x93e   :  { %958 = vrot.lane.b32.xlu1 %v2493_v42, %s2576_s10 }
 0x941   :  { %v2495_v43 = vpop.eup %2494 }
 0x942   :  { %929 = vrot.lane.b32.xlu1 %v2495_v43, %s2576_s10  ;;  %v2497_v46 = vpop.eup %2496 }
 0x943   :  { %v948_v47 = vadd.f32 1.0, %v2497_v46  ;;  %v2499_v48 = vpop.eup %2498 }
 0x944   :  { %v919_v49 = vadd.f32 1.0, %v2499_v48 }
 0x945   :  { %2500 = vrcp.f32 %v948_v47 }
 0x946   :  { %2502 = vrcp.f32 %v919_v49 }
 0x94f   :  { %v2501_v50 = vpop.eup %2500 }
 0x950   :  { %v2503_v53 = vpop.eup %2502  ;;  %v956_v57 = vmul.f32 %v2501_v50, %v954_v56 }
 0x951   :  { %v927_v61 = vmul.f32 %v2503_v53, %v925_v60  ;;  %v2071_v60 = vld [vmem:[%s3017_s1 + $0x4] sm:$0x3] }
 0x9b0   :  { %v959_v51 = vpop.permute.xlu1 %958 }
 0x9b1   :  { %v961_v52 = vmul.f32 %v2501_v50, %v959_v51 }
 0x9b3   :  { %963 = vrot.lane.b32.xlu1 %v961_v52, %s2575_s5 }
 0x9b4   :  { %v930_v54 = vpop.permute.xlu1 %929 }
 0x9b5   :  { %v932_v55 = vmul.f32 %v2503_v53, %v930_v54 }
 0x9b7   :  { %934 = vrot.lane.b32.xlu1 %v932_v55, %s2575_s5 }
 0xa25   :  { %v964_v58 = vpop.permute.xlu1 %963 }
 0xa26   :  { %v966_v59 = vadd.f32 %v964_v58, %v956_v57 }
 0xa28   :  { %2504 = vtanh.f32 %v966_v59 }
 0xa29   :  { %v935_v62 = vpop.permute.xlu1 %934 }
 0xa2a   :  { %v937_v63 = vadd.f32 %v935_v62, %v927_v61 }
 0xa2c   :  { %2506 = vtanh.f32 %v937_v63 }
 0xa32   :  { %v2505_v1 = vpop.eup %2504 }
 0xa33   :  { %969 = vrot.lane.b32.xlu0 %v2505_v1, %s2576_s10  ;;  %v2069_v1 = vld [vmem:[%s3018_s0 + $0xa] sm:$0x3] }
 0xa36   :  { %v2507_v2 = vpop.eup %2506 }
 0xa37   :  { %940 = vrot.lane.b32.xlu1 %v2507_v2, %s2576_s10 }
 0xaa5   :  { %v970_v3 = vpop.permute.xlu0 %969 }
 0xaa6   :  { %v972_v6 = vmul.f32 %v2501_v50, %v970_v3 }
 0xaa8   :  { %984 = vrot.lane.b32.xlu0 %v972_v6, %s2575_s5 }
 0xaa9   :  { %v941_v7 = vpop.permute.xlu1 %940 }
 0xaaa   :  { %v943_v8 = vmul.f32 %v2503_v53, %v941_v7 }
 0xaac   :  { %989 = vrot.lane.b32.xlu0 %v966_v59, %s2577_s11  ;;  %974 = vrot.lane.b32.xlu1 %v943_v8, %s2575_s5 }
 0xab0   :  { %979 = vrot.lane.b32.xlu0 %v937_v63, %s2577_s11 }
 0xb1a   :  { %v985_v10 = vpop.permute.xlu0 %984 }
 0xb1b   :  { %987 = vst.msk [vmem:[#allocation4] sm:$0x3] %vm17_vm0, %v985_v10  ;;  %996 = vst.msk [vmem:[#allocation7 + $0x8] sm:$0x3] %vm17_vm0, %v985_v10 }
 0xb1e   :  { %v990_v11 = vpop.permute.xlu0 %989  ;;  %v975_v14 = vpop.permute.xlu1 %974 }
 0xb1f   :  { %992 = vst.msk [vmem:[#allocation5] sm:$0x3] %vm17_vm0, %v990_v11  ;;  %977 = vst.msk [vmem:[#allocation2] sm:$0x3] %vm17_vm0, %v975_v14 }
 0xb20   :  { %994 = vst.msk [vmem:[#allocation6 + $0x6] sm:$0x3] %vm17_vm0, %v975_v14 }
 0xb22   :  { %v980_v15 = vpop.permute.xlu0 %979  ;;  %v1080_v16 = vld [vmem:[#allocation4] sm:$0x3] }
 0xb23   :  { %982 = vst.msk [vmem:[#allocation3] sm:$0x3] %vm17_vm0, %v980_v15  ;;  %2274 = vmatmul.mubr.msk.f32.vlgmr.msra.gmra.mrb[8].mxu1 %vm28_vm2, %v1080_v16 }
 0xb24   :  { %2410 = vmatpush3.bf16.msra.mxu1 %v2622_v5  ;;  %2295 = vmatprep.mubr.msk.f32.mxu1 %vm2574_vm1, %v2573_v4 }
 0xb25   :  { %2411 = vmatprep.subr.bf16.mxu1 %v2572_v0 }
 0xb26   :  { %v1188_v17 = vld [vmem:[#allocation5] sm:$0x3]  ;;  %v999_v18 = vld [vmem:[#allocation2] sm:$0x3] }
 0xb27   :  { %1197 = vrot.lane.b32.xlu0 %v1188_v17, %s2575_s5  ;;  %2263 = vmatmul.mubr.msk.f32.vlgmr.msra.gmra.mrb[8].mxu0 %vm28_vm2, %v999_v18 }
 0xb28   :  { %2404 = vmatpush3.bf16.msra.mxu0 %v2637_v9  ;;  %2413 = vmatpush3.bf16.msra.mxu1 %v2646_v12  ;;  %v2065_v9 = vld [vmem:[%s3017_s1 + $0x6] sm:$0x3] }
 0xb29   :  { %2405 = vmatprep.subr.bf16.mxu0 %v2572_v0  ;;  %2284 = vmatprep.mubr.msk.f32.mxu0 %vm2574_vm1, %v2573_v4 }
 0xb2a   :  { %v1159_v5 = vld [vmem:[#allocation3] sm:$0x3]  ;;  %2420 = vmatprep.subr.bf16.mxu1 %v2572_v0 }
 0xb2b   :  { %1168 = vrot.lane.b32.xlu0 %v1159_v5, %s2575_s5 }
 0xb2c   :  { %2407 = vmatpush3.bf16.msra.mxu0 %v2650_v13 }
 0xb2d   :  { %2414 = vmatprep.subr.bf16.mxu0 %v2572_v0 }
 0xb99   :  { %v1198_v38 = vpop.permute.xlu0 %1197 }
 0xb9d   :  { %v1169_v42 = vpop.permute.xlu0 %1168 }
 0xbf6   :  { %v1154_v19 = vpop.f32.mrb[8].mxu1 }
 0xbf7   :  { %v1158_v12 = vadd.f32 %v2065_v9, %v1154_v19  ;;  %v2275_v20 = vpop.f32.mrb[9].mxu1 }
 0xbf9   :  { %2508 = vtanh.f32 %v1158_v12  ;;  %v2068_v26 = vmul.f32 -1.442695, %v1158_v12 }
 0xbfa   :  { %v1073_v22 = vpop.f32.mrb[8].mxu0 }
 0xbfb   :  { %v1077_v23 = vadd.f32 %v2063_v21, %v1073_v22  ;;  %v2264_v24 = vpop.f32.mrb[9].mxu0 }
 0xbfd   :  { %2510 = vtanh.f32 %v1077_v23  ;;  %v2067_v27 = vmul.f32 -1.442695, %v1077_v23 }
 0xbfe   :  { %2512 = vpow2.f32 %v2068_v26 }
 0xbff   :  { %2514 = vpow2.f32 %v2067_v27 }
 0xc03   :  { %v2509_v25 = vpop.eup %2508 }
 0xc04   :  { %1202 = vrot.lane.b32.xlu1 %v2509_v25, %s2576_s10 }
 0xc07   :  { %v2511_v13 = vpop.eup %2510 }
 0xc08   :  { %1173 = vrot.lane.b32.xlu1 %v2511_v13, %s2576_s10  ;;  %v2513_v28 = vpop.eup %2512 }
 0xc09   :  { %v1192_v29 = vadd.f32 1.0, %v2513_v28  ;;  %v2515_v30 = vpop.eup %2514 }
 0xc0a   :  { %v1163_v31 = vadd.f32 1.0, %v2515_v30  ;;  %v1569_v30 = vld [vmem:[%s3015_s3] sm:$0xff] }
 0xc0b   :  { %2516 = vrcp.f32 %v1192_v29 }
 0xc0c   :  { %2518 = vrcp.f32 %v1163_v31  ;;  %v1570_v31 = vld [vmem:[%s3015_s3 + $0x8] sm:$0xff] }
 0xc15   :  { %v2517_v32 = vpop.eup %2516 }
 0xc16   :  { %v2519_v35 = vpop.eup %2518  ;;  %v1200_v39 = vmul.f32 %v2517_v32, %v1198_v38 }
 0xc17   :  { %v1171_v43 = vmul.f32 %v2519_v35, %v1169_v42 }
 0xc76   :  { %v1203_v33 = vpop.permute.xlu1 %1202 }
 0xc77   :  { %v1205_v34 = vmul.f32 %v2517_v32, %v1203_v33  ;;  %v1488_v33 = vld [vmem:[%s3016_s2] sm:$0xff] }
 0xc79   :  { %1207 = vrot.lane.b32.xlu1 %v1205_v34, %s2575_s5  ;;  %v1489_v34 = vld [vmem:[%s3016_s2 + $0x8] sm:$0xff] }
 0xc7a   :  { %v1174_v36 = vpop.permute.xlu1 %1173 }
 0xc7b   :  { %v1176_v37 = vmul.f32 %v2519_v35, %v1174_v36  ;;  %v2415_v36 = vpack.c.bf16 %v1489_v34, %v1488_v33  ;;  %v1810_v34 = vld [vmem:[%s3017_s1] sm:$0x3] }
 0xc7d   :  { %1178 = vrot.lane.b32.xlu1 %v1176_v37, %s2575_s5  ;;  %v1572_v37 = vld [vmem:[%s3015_s3 + $0x18] sm:$0xff] }
 0xceb   :  { %v1208_v40 = vpop.permute.xlu1 %1207 }
 0xcec   :  { %v1210_v41 = vadd.f32 %v1208_v40, %v1200_v39  ;;  %v1490_v39 = vld [vmem:[%s3016_s2 + $0x10] sm:$0xff]  ;;  %v1491_v40 = vld [vmem:[%s3016_s2 + $0x18] sm:$0xff] }
 0xcee   :  { %2520 = vtanh.f32 %v1210_v41 }
 0xcef   :  { %v1179_v44 = vpop.permute.xlu1 %1178 }
 0xcf0   :  { %v1181_v45 = vadd.f32 %v1179_v44, %v1171_v43 }
 0xcf2   :  { %2522 = vtanh.f32 %v1181_v45 }
 0xcf8   :  { %v2521_v46 = vpop.eup %2520 }
 0xcf9   :  { %1213 = vrot.lane.b32.xlu0 %v2521_v46, %s2576_s10 }
 0xcfc   :  { %v2523_v47 = vpop.eup %2522 }
 0xcfd   :  { %1184 = vrot.lane.b32.xlu1 %v2523_v47, %s2576_s10 }
 0xd6b   :  { %v1214_v48 = vpop.permute.xlu0 %1213 }
 0xd6c   :  { %v1216_v49 = vmul.f32 %v2517_v32, %v1214_v48  ;;  %v2421_v32 = vpack.c.bf16 %v1570_v31, %v1569_v30 }
 0xd6e   :  { %1228 = vrot.lane.b32.xlu0 %v1216_v49, %s2575_s5 }
 0xd6f   :  { %v1185_v50 = vpop.permute.xlu1 %1184 }
 0xd70   :  { %v1187_v51 = vmul.f32 %v2519_v35, %v1185_v50  ;;  %v1571_v35 = vld [vmem:[%s3015_s3 + $0x10] sm:$0xff] }
 0xd71   :  { %v2424_v38 = vpack.c.bf16 %v1572_v37, %v1571_v35 }
 0xd72   :  { %1233 = vrot.lane.b32.xlu0 %v1210_v41, %s2577_s11  ;;  %1218 = vrot.lane.b32.xlu1 %v1187_v51, %s2575_s5  ;;  %v2418_v41 = vpack.c.bf16 %v1491_v40, %v1490_v39 }
 0xd76   :  { %1223 = vrot.lane.b32.xlu0 %v1181_v45, %s2577_s11 }
 0xde0   :  { %v1229_v52 = vpop.permute.xlu0 %1228 }
 0xde1   :  { %1231 = vst.msk [vmem:[#allocation4] sm:$0x3] %vm17_vm0, %v1229_v52  ;;  %1240 = vst.msk [vmem:[#allocation7 + $0x6] sm:$0x3] %vm17_vm0, %v1229_v52 }
 0xde4   :  { %v1234_v53 = vpop.permute.xlu0 %1233  ;;  %v1219_v54 = vpop.permute.xlu1 %1218 }
 0xde5   :  { %1236 = vst.msk [vmem:[#allocation5] sm:$0x3] %vm17_vm0, %v1234_v53  ;;  %1221 = vst.msk [vmem:[#allocation2] sm:$0x3] %vm17_vm0, %v1219_v54 }
 0xde6   :  { %1238 = vst.msk [vmem:[#allocation6 + $0x8] sm:$0x3] %vm17_vm0, %v1219_v54  ;;  %v2077_v54 = vld [vmem:[%s3017_s1 + $0x2] sm:$0x3] }
 0xde8   :  { %v1224_v55 = vpop.permute.xlu0 %1223  ;;  %v1324_v56 = vld [vmem:[#allocation4] sm:$0x3] }
 0xde9   :  { %1226 = vst.msk [vmem:[#allocation3] sm:$0x3] %vm17_vm0, %v1224_v55  ;;  %2296 = vmatmul.mubr.msk.f32.vlgmr.msra.gmra.mrb[10].mxu1 %vm28_vm2, %v1324_v56 }
 0xdea   :  { %2317 = vmatprep.mubr.msk.f32.mxu1 %vm2574_vm1, %v2573_v4  ;;  %2422 = vmatpush3.bf16.msra.mxu1 %v2421_v32 }
 0xdeb   :  { %2423 = vmatprep.subr.bf16.mxu1 %v2572_v0 }
 0xdec   :  { %v1432_v57 = vld [vmem:[#allocation5] sm:$0x3]  ;;  %v1243_v58 = vld [vmem:[#allocation2] sm:$0x3] }
 0xded   :  { %1441 = vrot.lane.b32.xlu0 %v1432_v57, %s2575_s5  ;;  %2285 = vmatmul.mubr.msk.f32.vlgmr.msra.gmra.mrb[10].mxu0 %vm28_vm2, %v1243_v58  ;;  %v2075_v58 = vld [vmem:[%s3018_s0 + $0xc] sm:$0x3] }
 0xdee   :  { %2306 = vmatprep.mubr.msk.f32.mxu0 %vm2574_vm1, %v2573_v4  ;;  %2416 = vmatpush3.bf16.msra.mxu0 %v2415_v36 }
 0xdef   :  { %2425 = vmatpush3.bf16.msra.mxu1 %v2424_v38  ;;  %2417 = vmatprep.subr.bf16.mxu0 %v2572_v0 }
 0xdf0   :  { %v1403_v59 = vld [vmem:[#allocation3] sm:$0x3]  ;;  %2432 = vmatprep.subr.bf16.mxu1 %v2572_v0 }
 0xdf1   :  { %1412 = vrot.lane.b32.xlu0 %v1403_v59, %s2575_s5 }
 0xdf2   :  { %2419 = vmatpush3.bf16.msra.mxu0 %v2418_v41 }
 0xdf3   :  { %2426 = vmatprep.subr.bf16.mxu0 %v2572_v0 }
 0xe5f   :  { %v1442_v21 = vpop.permute.xlu0 %1441 }
 0xe63   :  { %v1413_v25 = vpop.permute.xlu0 %1412 }
 0xebc   :  { %v1398_v61 = vpop.f32.mrb[10].mxu1 }
 0xebd   :  { %v1402_v62 = vadd.f32 %v2071_v60, %v1398_v61  ;;  %v2297_v63 = vpop.f32.mrb[11].mxu1 }
 0xebf   :  { %2524 = vtanh.f32 %v1402_v62  ;;  %v2074_v10 = vmul.f32 -1.442695, %v1402_v62 }
 0xec0   :  { %v1317_v2 = vpop.f32.mrb[10].mxu0 }
 0xec1   :  { %v1321_v3 = vadd.f32 %v2069_v1, %v1317_v2  ;;  %v2286_v6 = vpop.f32.mrb[11].mxu0 }
 0xec3   :  { %2526 = vtanh.f32 %v1321_v3  ;;  %v2073_v11 = vmul.f32 -1.442695, %v1321_v3 }
 0xec4   :  { %2528 = vpow2.f32 %v2074_v10 }
 0xec5   :  { %2530 = vpow2.f32 %v2073_v11 }
 0xec9   :  { %v2525_v7 = vpop.eup %2524 }
 0xeca   :  { %1446 = vrot.lane.b32.xlu1 %v2525_v7, %s2576_s10 }
 0xecd   :  { %v2527_v8 = vpop.eup %2526 }
 0xece   :  { %1417 = vrot.lane.b32.xlu1 %v2527_v8, %s2576_s10  ;;  %v2529_v14 = vpop.eup %2528 }
 0xecf   :  { %v1436_v15 = vadd.f32 1.0, %v2529_v14  ;;  %v2531_v16 = vpop.eup %2530 }
 0xed0   :  { %v1407_v17 = vadd.f32 1.0, %v2531_v16 }
 0xed1   :  { %2532 = vrcp.f32 %v1436_v15 }
 0xed2   :  { %2534 = vrcp.f32 %v1407_v17 }
 0xedb   :  { %v2533_v18 = vpop.eup %2532 }
 0xedc   :  { %v2535_v19 = vpop.eup %2534  ;;  %v1444_v22 = vmul.f32 %v2533_v18, %v1442_v21 }
 0xedd   :  { %v1415_v13 = vmul.f32 %v2535_v19, %v1413_v25 }
 0xf3c   :  { %v1447_v5 = vpop.permute.xlu1 %1446 }
 0xf3d   :  { %v1449_v9 = vmul.f32 %v2533_v18, %v1447_v5 }
 0xf3f   :  { %1451 = vrot.lane.b32.xlu1 %v1449_v9, %s2575_s5 }
 0xf40   :  { %v1418_v12 = vpop.permute.xlu1 %1417 }
 0xf41   :  { %v1420_v20 = vmul.f32 %v2535_v19, %v1418_v12 }
 0xf43   :  { %1422 = vrot.lane.b32.xlu1 %v1420_v20, %s2575_s5 }
 0xfb1   :  { %v1452_v23 = vpop.permute.xlu1 %1451 }
 0xfb2   :  { %v1454_v24 = vadd.f32 %v1452_v23, %v1444_v22 }
 0xfb4   :  { %2536 = vtanh.f32 %v1454_v24 }
 0xfb5   :  { %v1423_v26 = vpop.permute.xlu1 %1422 }
 0xfb6   :  { %v1425_v27 = vadd.f32 %v1423_v26, %v1415_v13 }
 0xfb8   :  { %2538 = vtanh.f32 %v1425_v27 }
 0xfbe   :  { %v2537_v28 = vpop.eup %2536 }
 0xfbf   :  { %1457 = vrot.lane.b32.xlu0 %v2537_v28, %s2576_s10 }
 0xfc2   :  { %v2539_v29 = vpop.eup %2538 }
 0xfc3   :  { %1428 = vrot.lane.b32.xlu1 %v2539_v29, %s2576_s10 }
0x1031   :  { %v1458_v42 = vpop.permute.xlu0 %1457 }
0x1032   :  { %v1460_v43 = vmul.f32 %v2533_v18, %v1458_v42 }
0x1034   :  { %1472 = vrot.lane.b32.xlu0 %v1460_v43, %s2575_s5 }
0x1035   :  { %v1429_v44 = vpop.permute.xlu1 %1428 }
0x1036   :  { %v1431_v45 = vmul.f32 %v2535_v19, %v1429_v44 }
0x1038   :  { %1477 = vrot.lane.b32.xlu0 %v1454_v24, %s2577_s11  ;;  %1462 = vrot.lane.b32.xlu1 %v1431_v45, %s2575_s5 }
0x103c   :  { %1467 = vrot.lane.b32.xlu0 %v1425_v27, %s2577_s11 }
0x10a6   :  { %v1473_v46 = vpop.permute.xlu0 %1472 }
0x10a7   :  { %1475 = vst.msk [vmem:[#allocation4] sm:$0x3] %vm17_vm0, %v1473_v46  ;;  %1484 = vst.msk [vmem:[#allocation7 + $0x4] sm:$0x3] %vm17_vm0, %v1473_v46 }
0x10aa   :  { %v1478_v47 = vpop.permute.xlu0 %1477  ;;  %v1463_v48 = vpop.permute.xlu1 %1462 }
0x10ab   :  { %1480 = vst.msk [vmem:[#allocation5] sm:$0x3] %vm17_vm0, %v1478_v47  ;;  %1465 = vst.msk [vmem:[#allocation2] sm:$0x3] %vm17_vm0, %v1463_v48 }
0x10ac   :  { %1482 = vst.msk [vmem:[#allocation6 + $0xa] sm:$0x3] %vm17_vm0, %v1463_v48 }
0x10ae   :  { %v1468_v49 = vpop.permute.xlu0 %1467  ;;  %v1568_v50 = vld [vmem:[#allocation4] sm:$0x3] }
0x10af   :  { %1470 = vst.msk [vmem:[#allocation3] sm:$0x3] %vm17_vm0, %v1468_v49  ;;  %2318 = vmatmul.mubr.msk.f32.vlgmr.msra.gmra.mrb[12].mxu1 %vm28_vm2, %v1568_v50 }
0x10b0   :  { %2434 = vmatpush3.bf16.msra.mxu1 %v2421_v32  ;;  %2339 = vmatprep.mubr.msk.f32.mxu1 %vm2574_vm1, %v2573_v4 }
0x10b1   :  { %2435 = vmatprep.subr.bf16.mxu1 %v2572_v0 }
0x10b2   :  { %v1676_v51 = vld [vmem:[#allocation5] sm:$0x3]  ;;  %v1487_v52 = vld [vmem:[#allocation2] sm:$0x3] }
0x10b3   :  { %1685 = vrot.lane.b32.xlu0 %v1676_v51, %s2575_s5  ;;  %2307 = vmatmul.mubr.msk.f32.vlgmr.msra.gmra.mrb[12].mxu0 %vm28_vm2, %v1487_v52 }
0x10b4   :  { %2428 = vmatpush3.bf16.msra.mxu0 %v2415_v36  ;;  %2437 = vmatpush3.bf16.msra.mxu1 %v2424_v38  ;;  %v2081_v38 = vld [vmem:[%s3018_s0 + $0xe] sm:$0x3] }
0x10b5   :  { %2429 = vmatprep.subr.bf16.mxu0 %v2572_v0  ;;  %2328 = vmatprep.mubr.msk.f32.mxu0 %vm2574_vm1, %v2573_v4 }
0x10b6   :  { %v1647_v53 = vld [vmem:[#allocation3] sm:$0x3] }
0x10b7   :  { %1656 = vrot.lane.b32.xlu0 %v1647_v53, %s2575_s5 }
0x10b8   :  { %2431 = vmatpush3.bf16.msra.mxu0 %v2418_v41 }
0x1125   :  { %v1686_v16 = vpop.permute.xlu0 %1685 }
0x1129   :  { %v1657_v9 = vpop.permute.xlu0 %1656 }
0x1182   :  { %v1642_v55 = vpop.f32.mrb[12].mxu1 }
0x1183   :  { %v1646_v56 = vadd.f32 %v2077_v54, %v1642_v55  ;;  %v2319_v57 = vpop.f32.mrb[13].mxu1 }
0x1185   :  { %2540 = vtanh.f32 %v1646_v56  ;;  %v2080_v62 = vmul.f32 -1.442695, %v1646_v56 }
0x1186   :  { %v1561_v0 = vpop.f32.mrb[12].mxu0 }
0x1187   :  { %v1565_v59 = vadd.f32 %v2075_v58, %v1561_v0  ;;  %v2308_v60 = vpop.f32.mrb[13].mxu0 }
0x1189   :  { %2542 = vtanh.f32 %v1565_v59  ;;  %v2079_v63 = vmul.f32 -1.442695, %v1565_v59 }
0x118a   :  { %2544 = vpow2.f32 %v2080_v62 }
0x118b   :  { %2546 = vpow2.f32 %v2079_v63 }
0x118f   :  { %v2541_v4 = vpop.eup %2540 }
0x1190   :  { %1690 = vrot.lane.b32.xlu1 %v2541_v4, %s2576_s10 }
0x1193   :  { %v2543_v61 = vpop.eup %2542 }
0x1194   :  { %1661 = vrot.lane.b32.xlu1 %v2543_v61, %s2576_s10  ;;  %v2545_v1 = vpop.eup %2544 }
0x1195   :  { %v1680_v2 = vadd.f32 1.0, %v2545_v1  ;;  %v2547_v3 = vpop.eup %2546 }
0x1196   :  { %v1651_v6 = vadd.f32 1.0, %v2547_v3 }
0x1197   :  { %2548 = vrcp.f32 %v1680_v2  ;;  %v1982_v2 = vld [vmem:[#allocation7 + $0x6] sm:$0x3] }
0x1198   :  { %2550 = vrcp.f32 %v1651_v6 }
0x11a1   :  { %v2549_v7 = vpop.eup %2548 }
0x11a2   :  { %v2551_v11 = vpop.eup %2550  ;;  %v1688_v17 = vmul.f32 %v2549_v7, %v1686_v16  ;;  %v1983_v16 = vld [vmem:[#allocation7 + $0x8] sm:$0x3] }
0x11a3   :  { %v1659_v19 = vmul.f32 %v2551_v11, %v1657_v9 }
0x1202   :  { %v1691_v8 = vpop.permute.xlu1 %1690 }
0x1203   :  { %v1693_v10 = vmul.f32 %v2549_v7, %v1691_v8 }
0x1205   :  { %1695 = vrot.lane.b32.xlu1 %v1693_v10, %s2575_s5  ;;  %v1981_v10 = vld [vmem:[#allocation7 + $0x4] sm:$0x3] }
0x1206   :  { %v1662_v14 = vpop.permute.xlu1 %1661 }
0x1207   :  { %v1664_v15 = vmul.f32 %v2551_v11, %v1662_v14 }
0x1209   :  { %1666 = vrot.lane.b32.xlu1 %v1664_v15, %s2575_s5 }
0x1277   :  { %v1696_v18 = vpop.permute.xlu1 %1695 }
0x1278   :  { %v1698_v5 = vadd.f32 %v1696_v18, %v1688_v17  ;;  %v1984_v17 = vld [vmem:[#allocation7 + $0xa] sm:$0x3]  ;;  %v1974_v18 = vld [vmem:[#allocation6 + $0x6] sm:$0x3] }
0x127a   :  { %2552 = vtanh.f32 %v1698_v5 }
0x127b   :  { %v1667_v12 = vpop.permute.xlu1 %1666 }
0x127c   :  { %v1669_v20 = vadd.f32 %v1667_v12, %v1659_v19  ;;  %v1985_v19 = vld [vmem:[#allocation7 + $0xc] sm:$0x3]  ;;  %v1986_v12 = vld [vmem:[#allocation7 + $0xe] sm:$0x3] }
0x127e   :  { %2554 = vtanh.f32 %v1669_v20 }
0x1284   :  { %v2553_v21 = vpop.eup %2552 }
0x1285   :  { %1701 = vrot.lane.b32.xlu0 %v2553_v21, %s2576_s10  ;;  %v1973_v21 = vld [vmem:[#allocation6 + $0x4] sm:$0x3] }
0x1288   :  { %v2555_v22 = vpop.eup %2554 }
0x1289   :  { %1672 = vrot.lane.b32.xlu1 %v2555_v22, %s2576_s10 }
0x12f7   :  { %v1702_v23 = vpop.permute.xlu0 %1701 }
0x12f8   :  { %v1704_v24 = vmul.f32 %v2549_v7, %v1702_v23 }
0x12fa   :  { %1716 = vrot.lane.b32.xlu0 %v1704_v24, %s2575_s5 }
0x12fb   :  { %v1673_v25 = vpop.permute.xlu1 %1672 }
0x12fc   :  { %v1675_v13 = vmul.f32 %v2551_v11, %v1673_v25  ;;  %v1972_v11 = vld [vmem:[#allocation6 + $0x2] sm:$0x3]  ;;  %v1975_v25 = vld [vmem:[#allocation6 + $0x8] sm:$0x3] }
0x12fe   :  { %1721 = vrot.lane.b32.xlu0 %v1698_v5, %s2577_s11  ;;  %1706 = vrot.lane.b32.xlu1 %v1675_v13, %s2575_s5 }
0x1302   :  { %1711 = vrot.lane.b32.xlu0 %v1669_v20, %s2577_s11 }
0x136c   :  { %v1717_v26 = vpop.permute.xlu0 %1716 }
0x136d   :  { %1719 = vst.msk [vmem:[#allocation4] sm:$0x3] %vm17_vm0, %v1717_v26  ;;  %1728 = vst.msk [vmem:[#allocation7 + $0x2] sm:$0x3] %vm17_vm0, %v1717_v26  ;;  %v1976_v26 = vld [vmem:[#allocation6 + $0xa] sm:$0x3] }
0x1370   :  { %v1722_v27 = vpop.permute.xlu0 %1721  ;;  %v1707_v28 = vpop.permute.xlu1 %1706 }
0x1371   :  { %1724 = vst.msk [vmem:[#allocation5] sm:$0x3] %vm17_vm0, %v1722_v27  ;;  %1709 = vst.msk [vmem:[#allocation2] sm:$0x3] %vm17_vm0, %v1707_v28 }
0x1372   :  { %1726 = vst.msk [vmem:[#allocation6 + $0xc] sm:$0x3] %vm17_vm0, %v1707_v28 }
0x1374   :  { %v1712_v29 = vpop.permute.xlu0 %1711  ;;  %v1811_v30 = vld [vmem:[#allocation4] sm:$0x3]  ;;  %v1980_v1 = vld [vmem:[#allocation7 + $0x2] sm:$0x3] }
0x1375   :  { %1714 = vst.msk [vmem:[#allocation3] sm:$0x3] %vm17_vm0, %v1712_v29  ;;  %2340 = vmatmul.mubr.msk.f32.vlgmr.msra.gmra.mrb[14].mxu1 %vm28_vm2, %v1811_v30 }
0x1378   :  { %v1919_v31 = vld [vmem:[#allocation5] sm:$0x3]  ;;  %v1731_v32 = vld [vmem:[#allocation2] sm:$0x3] }
0x1379   :  { %1928 = vrot.lane.b32.xlu0 %v1919_v31, %s2575_s5  ;;  %2329 = vmatmul.mubr.msk.f32.vlgmr.msra.gmra.mrb[14].mxu0 %vm28_vm2, %v1731_v32  ;;  %v1977_v31 = vld [vmem:[#allocation6 + $0xc] sm:$0x3] }
0x137c   :  { %v1890_v33 = vld [vmem:[#allocation3] sm:$0x3] }
0x137d   :  { %1899 = vrot.lane.b32.xlu0 %v1890_v33, %s2575_s5 }
0x13eb   :  { %v1929_v56 = vpop.permute.xlu0 %1928 }
0x13ef   :  { %v1900_v59 = vpop.permute.xlu0 %1899 }
0x1448   :  { %v1885_v35 = vpop.f32.mrb[14].mxu1 }
0x1449   :  { %v1889_v36 = vadd.f32 %v1885_v35, %v1810_v34  ;;  %v2341_v37 = vpop.f32.mrb[15].mxu1 }
0x144b   :  { %2556 = vtanh.f32 %v1889_v36  ;;  %v2085_v44 = vmul.f32 -1.442695, %v1889_v36 }
0x144c   :  { %v1805_v39 = vpop.f32.mrb[14].mxu0 }
0x144d   :  { %v1809_v40 = vadd.f32 %v2081_v38, %v1805_v39  ;;  %v2330_v41 = vpop.f32.mrb[15].mxu0  ;;  %v1971_v38 = vld [vmem:[#allocation6] sm:$0x3] }
0x144f   :  { %2558 = vtanh.f32 %v1809_v40  ;;  %v2084_v45 = vmul.f32 -1.442695, %v1809_v40 }
0x1450   :  { %2560 = vpow2.f32 %v2085_v44 }
0x1451   :  { %2562 = vpow2.f32 %v2084_v45 }
0x1455   :  { %v2557_v42 = vpop.eup %2556 }
0x1456   :  { %1933 = vrot.lane.b32.xlu1 %v2557_v42, %s2576_s10 }
0x1459   :  { %v2559_v43 = vpop.eup %2558 }
0x145a   :  { %1904 = vrot.lane.b32.xlu1 %v2559_v43, %s2576_s10  ;;  %v2561_v46 = vpop.eup %2560 }
0x145b   :  { %v1923_v47 = vadd.f32 1.0, %v2561_v46  ;;  %v2563_v48 = vpop.eup %2562 }
0x145c   :  { %v1894_v49 = vadd.f32 1.0, %v2563_v48 }
0x145d   :  { %2564 = vrcp.f32 %v1923_v47 }
0x145e   :  { %2566 = vrcp.f32 %v1894_v49 }
0x1467   :  { %v2565_v50 = vpop.eup %2564 }
0x1468   :  { %v2567_v53 = vpop.eup %2566  ;;  %v1931_v57 = vmul.f32 %v2565_v50, %v1929_v56 }
0x1469   :  { %v1902_v60 = vmul.f32 %v2567_v53, %v1900_v59 }
0x14c8   :  { %v1934_v51 = vpop.permute.xlu1 %1933 }
0x14c9   :  { %v1936_v52 = vmul.f32 %v2565_v50, %v1934_v51 }
0x14cb   :  { %1938 = vrot.lane.b32.xlu1 %v1936_v52, %s2575_s5 }
0x14cc   :  { %v1905_v54 = vpop.permute.xlu1 %1904 }
0x14cd   :  { %v1907_v55 = vmul.f32 %v2567_v53, %v1905_v54 }
0x14cf   :  { %1909 = vrot.lane.b32.xlu1 %v1907_v55, %s2575_s5 }
0x153d   :  { %v1939_v58 = vpop.permute.xlu1 %1938 }
0x153e   :  { %v1941_v0 = vadd.f32 %v1939_v58, %v1931_v57 }
0x1540   :  { %2568 = vtanh.f32 %v1941_v0 }
0x1541   :  { %v1910_v4 = vpop.permute.xlu1 %1909 }
0x1542   :  { %v2951_v61 = vadd.f32 %v1910_v4, %v1902_v60 }
0x1544   :  { %2570 = vtanh.f32 %v2951_v61 }
0x154a   :  { %v2569_v62 = vpop.eup %2568 }
0x154b   :  { %1944 = vrot.lane.b32.xlu0 %v2569_v62, %s2576_s10 }
0x154e   :  { %v2571_v63 = vpop.eup %2570 }
0x154f   :  { %1915 = vrot.lane.b32.xlu1 %v2571_v63, %s2576_s10 }
0x1553   :  { %1997 = vrot.lane.b32.xlu1 %v1980_v1, %s2575_s5 }
0x1557   :  { %2001 = vrot.lane.b32.xlu1 %v1982_v2, %s2575_s5 }
0x15bd   :  { %v1945_v3 = vpop.permute.xlu0 %1944 }
0x15be   :  { %v1947_v6 = vmul.f32 %v2565_v50, %v1945_v3 }
0x15c0   :  { %1959 = vrot.lane.b32.xlu0 %v1947_v6, %s2575_s5 }
0x15c1   :  { %v1916_v7 = vpop.permute.xlu1 %1915 }
0x15c2   :  { %v1918_v8 = vmul.f32 %v2567_v53, %v1916_v7 }
0x15c4   :  { %1999 = vrot.lane.b32.xlu0 %v1981_v10, %s2575_s5  ;;  %1949 = vrot.lane.b32.xlu1 %v1918_v8, %s2575_s5 }
0x15c5   :  { %v1998_v14 = vpop.permute.xlu1 %1997 }
0x15c6   :  { %v2020_v15 = vsel %vm28_vm2, %v1972_v11, %v1998_v14 }
0x15c7   :  { %2029 = vst.msk [vmem:[%s3019_s4 + $0x2] sm:$0x3] %vm2027_vm3, %v2020_v15 }
0x15c8   :  { %2003 = vrot.lane.b32.xlu0 %v1983_v16, %s2575_s5  ;;  %2005 = vrot.lane.b32.xlu1 %v1984_v17, %s2575_s5 }
0x15c9   :  { %v2002_v5 = vpop.permute.xlu1 %2001 }
0x15ca   :  { %v2022_v9 = vsel %vm28_vm2, %v1974_v18, %v2002_v5 }
0x15cb   :  { %2031 = vst.msk [vmem:[%s3019_s4 + $0x6] sm:$0x3] %vm2027_vm3, %v2022_v9 }
0x15cc   :  { %2007 = vrot.lane.b32.xlu0 %v1985_v19, %s2575_s5  ;;  %2009 = vrot.lane.b32.xlu1 %v1986_v12, %s2575_s5 }
0x15d0   :  { %1964 = vrot.lane.b32.xlu1 %v1941_v0, %s2577_s11 }
0x1632   :  { %v1960_v20 = vpop.permute.xlu0 %1959 }
0x1633   :  { %1962 = vst.msk [vmem:[#allocation4] sm:$0x3] %vm17_vm0, %v1960_v20  ;;  %1970 = vst.msk [vmem:[#allocation7] sm:$0x3] %vm17_vm0, %v1960_v20 }
0x1636   :  { %v2000_v22 = vpop.permute.xlu0 %1999  ;;  %v1950_v23 = vpop.permute.xlu1 %1949 }
0x1637   :  { %v2021_v24 = vsel %vm28_vm2, %v1973_v21, %v2000_v22  ;;  %1952 = vst.msk [vmem:[#allocation2] sm:$0x3] %vm17_vm0, %v1950_v23  ;;  %1969 = vst.msk [vmem:[#allocation6 + $0xe] sm:$0x3] %vm17_vm0, %v1950_v23 }
0x1638   :  { %2030 = vst.msk [vmem:[%s3019_s4 + $0x4] sm:$0x3] %vm2027_vm3, %v2021_v24 }
0x163a   :  { %v2004_v13 = vpop.permute.xlu0 %2003  ;;  %v2006_v27 = vpop.permute.xlu1 %2005  ;;  %v1979_v28 = vld [vmem:[#allocation7] sm:$0x3] }
0x163b   :  { %v2023_v29 = vsel %vm28_vm2, %v1975_v25, %v2004_v13  ;;  %v2024_v30 = vsel %vm28_vm2, %v1976_v26, %v2006_v27  ;;  %1995 = vrot.lane.b32.xlu0 %v1979_v28, %s2575_s5 }
0x163c   :  { %2032 = vst.msk [vmem:[%s3019_s4 + $0x8] sm:$0x3] %vm2027_vm3, %v2023_v29  ;;  %2033 = vst.msk [vmem:[%s3019_s4 + $0xa] sm:$0x3] %vm2027_vm3, %v2024_v30 }
0x163e   :  { %v2008_v32 = vpop.permute.xlu0 %2007  ;;  %v1978_v33 = vld [vmem:[#allocation6 + $0xe] sm:$0x3]  ;;  %v2010_v34 = vpop.permute.xlu1 %2009 }
0x163f   :  { %v2025_v35 = vsel %vm28_vm2, %v1977_v31, %v2008_v32  ;;  %v2026_v36 = vsel %vm28_vm2, %v1978_v33, %v2010_v34  ;;  %1954 = vrot.lane.b32.xlu0 %v2951_v61, %s2577_s11 }
0x1640   :  { %2034 = vst.msk [vmem:[%s3019_s4 + $0xc] sm:$0x3] %vm2027_vm3, %v2025_v35  ;;  %2035 = vst.msk [vmem:[%s3019_s4 + $0xe] sm:$0x3] %vm2027_vm3, %v2026_v36 }
0x1642   :  { %v1965_v37 = vpop.permute.xlu1 %1964 }
0x1643   :  { %1967 = vst.msk [vmem:[#allocation5] sm:$0x3] %vm17_vm0, %v1965_v37 }
0x16ad   :  { %v1996_v39 = vpop.permute.xlu0 %1995 }
0x16ae   :  { %v2019_v40 = vsel %vm28_vm2, %v1971_v38, %v1996_v39 }
0x16af   :  { %2028 = vst.msk [vmem:[%s3019_s4] sm:$0x3] %vm2027_vm3, %v2019_v40 }
0x16b1   :  { %v1955_v41 = vpop.permute.xlu0 %1954 }
0x16b2   :  { %1957 = vst.msk [vmem:[#allocation3] sm:$0x3] %vm17_vm0, %v1955_v41 }

</bundles_post_ra>
